<compile_context>
chip_gen: v7x
topology: tpu7x:2x2x1
jax: 0.10.0
libtpu: 0.0.40
codegen_flags: <defaults>
</compile_context>

<pallas_src>
import functools

import jax
import jax.numpy as jnp
import numpy as np
from jax.experimental import pallas as pl
from jax.experimental.pallas import tpu as pltpu

# ----------------------------- configuration -----------------------------
DIM_NODE = 16     # dim_node_feat
DIM_EDGE = 8      # dim_edge_feat
DIM_TIME = 8      # dim_time
NUM_HEAD = 2
DIM_OUT = 32
N_DST = 16        # number of dst nodes
FANOUT = 8        # neighbors (edges) per dst node
LN_EPS = 1e-5
LEAKY_SLOPE = 0.2
MAX_TILE_N = 256  # dst nodes per grid step (upper bound; VMEM-safe on v7x)


def _round_up(x, m):
    return ((x + m - 1) // m) * m


# ------------------------------- kernel ----------------------------------
def _attn_kernel(h_dst_ref, edge_ref,
                 wt_ref, bt_ref, wq_n_ref, q_bias_ref,
                 wkv_p_ref, wkv_t_ref, bkv_ref,
                 wo_agg_ref, wo_dst_ref, bo_ref,
                 gamma_ref, beta_ref, hb_ref,
                 out_ref,
                 *, dim_out, fanout, dt_col):
    f32 = jnp.float32
    tn = h_dst_ref.shape[0]
    fo = fanout

    h_dst = h_dst_ref[...].astype(f32)        # (TN, Dn)
    edge = edge_ref[...].astype(f32)          # (TN*F, PW)  packed [h_ngh|ef|dt|0]
    dt = edge[:, dt_col:dt_col + 1]           # (TN*F, 1)

    # TimeEncode over edges: cos(dt*w + b). Zero-time part is folded into q_bias.
    tf = jnp.cos(dt * wt_ref[...] + bt_ref[...])                       # (TN*F, Dt)

    # Q projection (per dst node); zero-time encoding pre-folded into q_bias.
    q = jnp.dot(h_dst, wq_n_ref[...], preferred_element_type=f32) + q_bias_ref[...]  # (TN, Do)

    # Fused K|V projection: one slab-wide matmul (node+edge features, padded
    # weight rows are zero) + one small time-feature matmul.
    kv = (jnp.dot(edge, wkv_p_ref[...], preferred_element_type=f32)
          + jnp.dot(tf, wkv_t_ref[...], preferred_element_type=f32)
          + bkv_ref[...])                                              # (TN*F, 2*Do)

    k3 = kv[:, :dim_out].reshape(tn, fo, dim_out)                      # (TN, F, Do)
    v3 = kv[:, dim_out:].reshape(tn, fo, dim_out)                      # (TN, F, Do)

    # Multi-head attention logits, broadcast to every lane of the head via a
    # block-diagonal (Do, Do) matmul: lane d of `logits` holds the logit of
    # the head that lane d belongs to.
    prod = q[:, None, :] * k3                                          # (TN, F, Do)
    logits = jnp.dot(prod.reshape(tn * fo, dim_out), hb_ref[...],
                     preferred_element_type=f32).reshape(tn, fo, dim_out)
    logits = jnp.where(logits >= 0, logits, LEAKY_SLOPE * logits)      # leaky-ReLU

    # edge_softmax over the F sampled neighbors of each dst node (lane-wise,
    # exact division for accuracy).
    m = jnp.max(logits, axis=1, keepdims=True)                         # (TN, 1, Do)
    e = jnp.exp(logits - m)
    att = e / jnp.sum(e, axis=1, keepdims=True)                        # (TN, F, Do)
    # TODO(synk): att_dropout is identity (eval mode).

    # Weighted aggregation of V (att already lane-dense, all heads at once).
    agg = jnp.sum(v3 * att, axis=1)                                    # (TN, Do)

    # Output projection (split wo, no concat) + ReLU + LayerNorm.
    rst = (jnp.dot(agg, wo_agg_ref[...], preferred_element_type=f32)
           + jnp.dot(h_dst, wo_dst_ref[...], preferred_element_type=f32)
           + bo_ref[...])
    rst = jnp.maximum(rst, 0.0)                                        # dropout = identity

    mean = jnp.mean(rst, axis=-1, keepdims=True)
    var = jnp.mean((rst - mean) ** 2, axis=-1, keepdims=True)
    ln = (rst - mean) * jax.lax.rsqrt(var + LN_EPS)
    out_ref[...] = (ln * gamma_ref[...] + beta_ref[...]).astype(out_ref.dtype)


# ------------------------------ wrapper -----------------------------------
def transformer_attention_layer(h_dst, h_ngh, ef, dt, params, tile_n=None):
    N, Dn = h_dst.shape
    _, F, De = ef.shape
    Dt = params['wt'].shape[1]
    Do = params['wq'].shape[1]
    H = NUM_HEAD
    dh = Do // H

    # ---- pre-split / fuse weights in the wrapper (free; removes in-kernel concats)
    wq = params['wq']
    wq_n, wq_t = wq[:Dn], wq[Dn:]
    # zero-time encoding folded into the Q bias: cos(bt) @ wq_t + bq
    q_bias = jnp.cos(params['bt']) @ wq_t + params['bq']               # (1, Do)

    wkv = jnp.concatenate([params['wk'], params['wv']], axis=1)        # (C, 2*Do)
    wkv_ne = wkv[:Dn + De]                                             # (Dn+De, 2*Do)
    wkv_t = wkv[Dn + De:]                                              # (Dt, 2*Do)
    bkv = jnp.concatenate([params['bk'], params['bv']], axis=1)        # (1, 2*Do)

    wo_agg = params['wo'][:Do]
    wo_dst = params['wo'][Do:]

    # block-diagonal head-broadcast matrix: hb[d, e] = 1 iff lanes d, e share a head
    hb = jnp.asarray(
        (np.arange(Do)[:, None] // dh == np.arange(Do)[None, :] // dh).astype(np.float32))

    # ---- pack all edge-level inputs into ONE contiguous slab (one DMA per step)
    dt_col = Dn + De
    PW = _round_up(dt_col + 1, 8)                                      # 32 for defaults
    cols = [h_ngh.reshape(N * F, Dn), ef.reshape(N * F, De), dt.reshape(N * F, 1)]
    if PW > dt_col + 1:
        cols.append(jnp.zeros((N * F, PW - dt_col - 1), dtype=h_ngh.dtype))
    packed = jnp.concatenate(cols, axis=1)                             # (N*F, PW)

    # zero-pad the node+edge KV weight to the slab width -> single slab matmul
    wkv_p = jnp.zeros((PW, 2 * Do), dtype=wkv.dtype).at[:Dn + De].set(wkv_ne)

    # ---- tile choice & padding (handles N not divisible by the tile)
    if tile_n is None:
        tile_n = min(_round_up(N, 8), MAX_TILE_N)
        # give the single "parallel" grid axis >= 2 programs so both of v7x's
        # TensorCores get work (no effect on correctness; v5e/v6e have 1 TC).
        if N > 8:
            tile_n = min(tile_n, _round_up(-(-N // 2), 8))
    tile_n = max(8, _round_up(tile_n, 8))
    n_pad = _round_up(N, tile_n)
    if n_pad != N:
        pad_n = n_pad - N
        h_dst = jnp.pad(h_dst, ((0, pad_n), (0, 0)))
        packed = jnp.pad(packed, ((0, pad_n * F), (0, 0)))

    grid = (n_pad // tile_n,)

    weights = (params['wt'], params['bt'], wq_n, q_bias,
               wkv_p, wkv_t, bkv,
               wo_agg, wo_dst, params['bo'],
               params['gamma'], params['beta'], hb)

    def full_spec(arr):
        nd = arr.ndim
        return pl.BlockSpec(arr.shape, lambda i, _nd=nd: (0,) * _nd)

    kern = functools.partial(_attn_kernel, dim_out=Do, fanout=F, dt_col=dt_col)

    flops = int(
        2 * n_pad * F * PW * (2 * Do)       # packed K|V projection
        + 2 * n_pad * F * Dt * (2 * Do)     # time-feature K|V projection
        + 2 * n_pad * Dn * Do               # Q projection
        + 2 * n_pad * F * Do * Do           # head-broadcast logits
        + 2 * n_pad * (Do + Dn) * Do        # output projection
        + 6 * n_pad * F * Do)               # prod / softmax / aggregation elementwise
    transcendentals = int(n_pad * F * (Dt + Do))                       # cos + exp
    bytes_accessed = int(
        4 * (n_pad * (Dn + F * PW)          # inputs
             + n_pad * Do                   # output
             + sum(int(np.prod(w.shape)) for w in weights)))

    out = pl.pallas_call(
        kern,
        out_shape=jax.ShapeDtypeStruct((n_pad, Do), jnp.float32),
        grid_spec=pltpu.PrefetchScalarGridSpec(
            num_scalar_prefetch=0,
            grid=grid,
            in_specs=[
                pl.BlockSpec((tile_n, Dn), lambda i: (i, 0)),      # h_dst
                pl.BlockSpec((tile_n * F, PW), lambda i: (i, 0)),  # packed edge slab
            ] + [full_spec(w) for w in weights],
            out_specs=pl.BlockSpec((tile_n, Do), lambda i: (i, 0)),
        ),
        compiler_params=pltpu.CompilerParams(
            dimension_semantics=("parallel",),
            vmem_limit_bytes=32 * 1024 * 1024),
        cost_estimate=pl.CostEstimate(
            flops=flops, transcendentals=transcendentals,
            bytes_accessed=bytes_accessed),
    )(h_dst, packed, *weights)

    return out[:N]


# ---------------------------- pure-JAX reference ---------------------------
def reference(h_dst, h_ngh, ef, dt, params):
    wt, bt = params['wt'][0], params['bt'][0]
    tf = jnp.cos(dt[..., None] * wt + bt)                       # (N, F, Dt)
    ztf = jnp.broadcast_to(jnp.cos(bt), (h_dst.shape[0], bt.shape[0]))

    Q = jnp.concatenate([h_dst, ztf], axis=1) @ params['wq'] + params['bq']
    kv_in = jnp.concatenate([h_ngh, ef, tf], axis=2)
    K = jnp.einsum('nfc,cd->nfd', kv_in, params['wk']) + params['bk']
    V = jnp.einsum('nfc,cd->nfd', kv_in, params['wv']) + params['bv']

    N, F, _ = K.shape
    dh = DIM_OUT // NUM_HEAD
    Qh = Q.reshape(N, NUM_HEAD, dh)
    Kh = K.reshape(N, F, NUM_HEAD, dh)
    Vh = V.reshape(N, F, NUM_HEAD, dh)

    logits = jnp.sum(Qh[:, None] * Kh, axis=-1)                 # (N, F, H)
    logits = jnp.where(logits >= 0, logits, LEAKY_SLOPE * logits)
    att = jax.nn.softmax(logits, axis=1)                        # edge_softmax over neighbors
    agg = jnp.sum(Vh * att[..., None], axis=1).reshape(N, DIM_OUT)

    rst = jnp.concatenate([agg, h_dst], axis=1) @ params['wo'] + params['bo']
    rst = jnp.maximum(rst, 0.0)
    mean = rst.mean(-1, keepdims=True)
    var = ((rst - mean) ** 2).mean(-1, keepdims=True)
    return (rst - mean) / jnp.sqrt(var + LN_EPS) * params['gamma'] + params['beta']


# --------------------------------- main ------------------------------------
if __name__ == "__main__":
    key = jax.random.PRNGKey(0)
    keys = jax.random.split(key, 12)

    # inputs
    h_dst = jax.random.normal(keys[0], (N_DST, DIM_NODE), dtype=jnp.float32)
    h_ngh = jax.random.normal(keys[1], (N_DST, FANOUT, DIM_NODE), dtype=jnp.float32)
    ef = jax.random.normal(keys[2], (N_DST, FANOUT, DIM_EDGE), dtype=jnp.float32)
    dt = jax.random.uniform(keys[3], (N_DST, FANOUT), dtype=jnp.float32) * 10.0

    # parameters (matching the PyTorch module shapes; weights pre-transposed to
    # (in, out) for the x @ W convention)
    d_q_in = DIM_NODE + DIM_TIME
    d_kv_in = DIM_NODE + DIM_EDGE + DIM_TIME
    d_o_in = DIM_NODE + DIM_OUT
    params = {
        # TimeEncode: weight = 1 / 10**linspace(0, 9, dim_time), bias = 0
        'wt': jnp.asarray(1.0 / 10 ** np.linspace(0, 9, DIM_TIME, dtype=np.float32)).reshape(1, DIM_TIME),
        'bt': jnp.zeros((1, DIM_TIME), dtype=jnp.float32),
        'wq': 0.1 * jax.random.normal(keys[4], (d_q_in, DIM_OUT), dtype=jnp.float32),
        'bq': 0.01 * jax.random.normal(keys[5], (1, DIM_OUT), dtype=jnp.float32),
        'wk': 0.1 * jax.random.normal(keys[6], (d_kv_in, DIM_OUT), dtype=jnp.float32),
        'bk': 0.01 * jax.random.normal(keys[7], (1, DIM_OUT), dtype=jnp.float32),
        'wv': 0.1 * jax.random.normal(keys[8], (d_kv_in, DIM_OUT), dtype=jnp.float32),
        'bv': 0.01 * jax.random.normal(keys[9], (1, DIM_OUT), dtype=jnp.float32),
        'wo': 0.1 * jax.random.normal(keys[10], (d_o_in, DIM_OUT), dtype=jnp.float32),
        'bo': 0.01 * jax.random.normal(keys[11], (1, DIM_OUT), dtype=jnp.float32),
        'gamma': jnp.ones((1, DIM_OUT), dtype=jnp.float32),
        'beta': jnp.zeros((1, DIM_OUT), dtype=jnp.float32),
    }

    out = transformer_attention_layer(h_dst, h_ngh, ef, dt, params)
    out = jax.block_until_ready(out)

    ref = reference(h_dst, h_ngh, ef, dt, params)
    np.testing.assert_allclose(np.asarray(out), np.asarray(ref), rtol=2e-3, atol=2e-3)

    print("KERNEL_OK")
</pallas_src>

<mosaic_0001>
module attributes {stable_mosaic.version = 11 : i64} {
  func.func @_attn_kernel(%arg0: i32, %arg1: memref<8x16xf32, #tpu.memory_space<vmem>>, %arg2: memref<64x32xf32, #tpu.memory_space<vmem>>, %arg3: memref<1x8xf32, #tpu.memory_space<vmem>>, %arg4: memref<1x8xf32, #tpu.memory_space<vmem>>, %arg5: memref<16x32xf32, #tpu.memory_space<vmem>>, %arg6: memref<1x32xf32, #tpu.memory_space<vmem>>, %arg7: memref<32x64xf32, #tpu.memory_space<vmem>>, %arg8: memref<8x64xf32, #tpu.memory_space<vmem>>, %arg9: memref<1x64xf32, #tpu.memory_space<vmem>>, %arg10: memref<32x32xf32, #tpu.memory_space<vmem>>, %arg11: memref<16x32xf32, #tpu.memory_space<vmem>>, %arg12: memref<1x32xf32, #tpu.memory_space<vmem>>, %arg13: memref<1x32xf32, #tpu.memory_space<vmem>>, %arg14: memref<1x32xf32, #tpu.memory_space<vmem>>, %arg15: memref<32x32xf32, #tpu.memory_space<vmem>>, %arg16: memref<8x32xf32, #tpu.memory_space<vmem>>) attributes {dimension_semantics = [#tpu.dimension_semantics<parallel>], iteration_bounds = array<i64: 2>, scalar_prefetch = 0 : i64, scratch_operands = 0 : i64, tpu.core_type = #tpu.core_type<tc>, window_params = [{transform_indices = @transform_0, window_bounds = array<i64: 8, 16>}, {transform_indices = @transform_1, window_bounds = array<i64: 64, 32>}, {pipeline_mode = #tpu.pipeline_mode<synchronous>, transform_indices = @transform_2, window_bounds = array<i64: 1, 8>}, {pipeline_mode = #tpu.pipeline_mode<synchronous>, transform_indices = @transform_3, window_bounds = array<i64: 1, 8>}, {pipeline_mode = #tpu.pipeline_mode<synchronous>, transform_indices = @transform_4, window_bounds = array<i64: 16, 32>}, {pipeline_mode = #tpu.pipeline_mode<synchronous>, transform_indices = @transform_5, window_bounds = array<i64: 1, 32>}, {pipeline_mode = #tpu.pipeline_mode<synchronous>, transform_indices = @transform_6, window_bounds = array<i64: 32, 64>}, {pipeline_mode = #tpu.pipeline_mode<synchronous>, transform_indices = @transform_7, window_bounds = array<i64: 8, 64>}, {pipeline_mode = #tpu.pipeline_mode<synchronous>, transform_indices = @transform_8, window_bounds = array<i64: 1, 64>}, {pipeline_mode = #tpu.pipeline_mode<synchronous>, transform_indices = @transform_9, window_bounds = array<i64: 32, 32>}, {pipeline_mode = #tpu.pipeline_mode<synchronous>, transform_indices = @transform_10, window_bounds = array<i64: 16, 32>}, {pipeline_mode = #tpu.pipeline_mode<synchronous>, transform_indices = @transform_11, window_bounds = array<i64: 1, 32>}, {pipeline_mode = #tpu.pipeline_mode<synchronous>, transform_indices = @transform_12, window_bounds = array<i64: 1, 32>}, {pipeline_mode = #tpu.pipeline_mode<synchronous>, transform_indices = @transform_13, window_bounds = array<i64: 1, 32>}, {pipeline_mode = #tpu.pipeline_mode<synchronous>, transform_indices = @transform_14, window_bounds = array<i64: 32, 32>}, {transform_indices = @transform_15, window_bounds = array<i64: 8, 32>}]} {
    %c0 = arith.constant 0 : index
    %c0_0 = arith.constant 0 : index
    %0 = vector.load %arg1[%c0, %c0_0] : memref<8x16xf32, #tpu.memory_space<vmem>>, vector<8x16xf32>
    %c0_1 = arith.constant 0 : index
    %c0_2 = arith.constant 0 : index
    %1 = vector.load %arg2[%c0_1, %c0_2] : memref<64x32xf32, #tpu.memory_space<vmem>>, vector<64x32xf32>
    %2 = vector.extract_strided_slice %1 {offsets = [0, 24], sizes = [64, 1], strides = [1, 1]} : vector<64x32xf32> to vector<64x1xf32>
    %c0_3 = arith.constant 0 : index
    %c0_4 = arith.constant 0 : index
    %3 = vector.load %arg3[%c0_3, %c0_4] : memref<1x8xf32, #tpu.memory_space<vmem>>, vector<1x8xf32>
    %4 = vector.broadcast %2 : vector<64x1xf32> to vector<64x8xf32>
    %5 = vector.broadcast %3 : vector<1x8xf32> to vector<64x8xf32>
    %6 = arith.mulf %4, %5 : vector<64x8xf32>
    %c0_5 = arith.constant 0 : index
    %c0_6 = arith.constant 0 : index
    %7 = vector.load %arg4[%c0_5, %c0_6] : memref<1x8xf32, #tpu.memory_space<vmem>>, vector<1x8xf32>
    %8 = vector.broadcast %7 : vector<1x8xf32> to vector<64x8xf32>
    %9 = arith.addf %6, %8 : vector<64x8xf32>
    %10 = math.cos %9 : vector<64x8xf32>
    %c0_7 = arith.constant 0 : index
    %c0_8 = arith.constant 0 : index
    %11 = vector.load %arg5[%c0_7, %c0_8] : memref<16x32xf32, #tpu.memory_space<vmem>>, vector<16x32xf32>
    %cst = arith.constant dense<0.000000e+00> : vector<8x32xf32>
    %12 = tpu.matmul %0, %11, %cst {dimension_numbers = #tpu.dot_dimension_numbers<[1], [0], [0], [1], [0, 0, 1, 1], [], []>} : vector<8x16xf32>, vector<16x32xf32>, vector<8x32xf32> -> vector<8x32xf32>
    %c0_9 = arith.constant 0 : index
    %c0_10 = arith.constant 0 : index
    %13 = vector.load %arg6[%c0_9, %c0_10] : memref<1x32xf32, #tpu.memory_space<vmem>>, vector<1x32xf32>
    %14 = vector.broadcast %13 : vector<1x32xf32> to vector<8x32xf32>
    %15 = arith.addf %12, %14 : vector<8x32xf32>
    %c0_11 = arith.constant 0 : index
    %c0_12 = arith.constant 0 : index
    %16 = vector.load %arg7[%c0_11, %c0_12] : memref<32x64xf32, #tpu.memory_space<vmem>>, vector<32x64xf32>
    %cst_13 = arith.constant dense<0.000000e+00> : vector<64x64xf32>
    %17 = tpu.matmul %1, %16, %cst_13 {dimension_numbers = #tpu.dot_dimension_numbers<[1], [0], [0], [1], [0, 0, 1, 1], [], []>} : vector<64x32xf32>, vector<32x64xf32>, vector<64x64xf32> -> vector<64x64xf32>
    %c0_14 = arith.constant 0 : index
    %c0_15 = arith.constant 0 : index
    %18 = vector.load %arg8[%c0_14, %c0_15] : memref<8x64xf32, #tpu.memory_space<vmem>>, vector<8x64xf32>
    %cst_16 = arith.constant dense<0.000000e+00> : vector<64x64xf32>
    %19 = tpu.matmul %10, %18, %cst_16 {dimension_numbers = #tpu.dot_dimension_numbers<[1], [0], [0], [1], [0, 0, 1, 1], [], []>} : vector<64x8xf32>, vector<8x64xf32>, vector<64x64xf32> -> vector<64x64xf32>
    %20 = arith.addf %17, %19 : vector<64x64xf32>
    %c0_17 = arith.constant 0 : index
    %c0_18 = arith.constant 0 : index
    %21 = vector.load %arg9[%c0_17, %c0_18] : memref<1x64xf32, #tpu.memory_space<vmem>>, vector<1x64xf32>
    %22 = vector.broadcast %21 : vector<1x64xf32> to vector<64x64xf32>
    %23 = arith.addf %20, %22 : vector<64x64xf32>
    %24 = vector.extract_strided_slice %23 {offsets = [0, 0], sizes = [64, 32], strides = [1, 1]} : vector<64x64xf32> to vector<64x32xf32>
    %25 = vector.shape_cast %24 : vector<64x32xf32> to vector<8x8x32xf32>
    %26 = vector.extract_strided_slice %23 {offsets = [0, 32], sizes = [64, 32], strides = [1, 1]} : vector<64x64xf32> to vector<64x32xf32>
    %27 = vector.shape_cast %26 : vector<64x32xf32> to vector<8x8x32xf32>
    %28 = vector.shape_cast %15 : vector<8x32xf32> to vector<8x1x32xf32>
    %29 = vector.broadcast %28 : vector<8x1x32xf32> to vector<8x8x32xf32>
    %30 = arith.mulf %29, %25 : vector<8x8x32xf32>
    %31 = vector.shape_cast %30 : vector<8x8x32xf32> to vector<64x32xf32>
    %c0_19 = arith.constant 0 : index
    %c0_20 = arith.constant 0 : index
    %32 = vector.load %arg15[%c0_19, %c0_20] : memref<32x32xf32, #tpu.memory_space<vmem>>, vector<32x32xf32>
    %cst_21 = arith.constant dense<0.000000e+00> : vector<64x32xf32>
    %33 = tpu.matmul %31, %32, %cst_21 {dimension_numbers = #tpu.dot_dimension_numbers<[1], [0], [0], [1], [0, 0, 1, 1], [], []>} : vector<64x32xf32>, vector<32x32xf32>, vector<64x32xf32> -> vector<64x32xf32>
    %34 = vector.shape_cast %33 : vector<64x32xf32> to vector<8x8x32xf32>
    %cst_22 = arith.constant 0.000000e+00 : f32
    %35 = vector.broadcast %cst_22 : f32 to vector<8x8x32xf32>
    %36 = arith.cmpf oge, %34, %35 : vector<8x8x32xf32>
    %cst_23 = arith.constant 2.000000e-01 : f32
    %37 = vector.broadcast %cst_23 : f32 to vector<8x8x32xf32>
    %38 = arith.mulf %37, %34 : vector<8x8x32xf32>
    %39 = arith.select %36, %34, %38 : vector<8x8x32xi1>, vector<8x8x32xf32>
    %cst_24 = arith.constant dense<0xFF800000> : vector<8x32xf32>
    %40 = vector.multi_reduction <maximumf>, %39, %cst_24 [1] : vector<8x8x32xf32> to vector<8x32xf32>
    %41 = vector.shape_cast %40 : vector<8x32xf32> to vector<8x1x32xf32>
    %42 = vector.broadcast %41 : vector<8x1x32xf32> to vector<8x8x32xf32>
    %43 = arith.subf %39, %42 : vector<8x8x32xf32>
    %44 = math.exp %43 : vector<8x8x32xf32>
    %cst_25 = arith.constant dense<0.000000e+00> : vector<8x32xf32>
    %45 = vector.multi_reduction <add>, %44, %cst_25 [1] : vector<8x8x32xf32> to vector<8x32xf32>
    %46 = vector.shape_cast %45 : vector<8x32xf32> to vector<8x1x32xf32>
    %47 = vector.broadcast %46 : vector<8x1x32xf32> to vector<8x8x32xf32>
    %48 = arith.divf %44, %47 : vector<8x8x32xf32>
    %49 = arith.mulf %27, %48 : vector<8x8x32xf32>
    %cst_26 = arith.constant dense<0.000000e+00> : vector<8x32xf32>
    %50 = vector.multi_reduction <add>, %49, %cst_26 [1] : vector<8x8x32xf32> to vector<8x32xf32>
    %c0_27 = arith.constant 0 : index
    %c0_28 = arith.constant 0 : index
    %51 = vector.load %arg10[%c0_27, %c0_28] : memref<32x32xf32, #tpu.memory_space<vmem>>, vector<32x32xf32>
    %cst_29 = arith.constant dense<0.000000e+00> : vector<8x32xf32>
    %52 = tpu.matmul %50, %51, %cst_29 {dimension_numbers = #tpu.dot_dimension_numbers<[1], [0], [0], [1], [0, 0, 1, 1], [], []>} : vector<8x32xf32>, vector<32x32xf32>, vector<8x32xf32> -> vector<8x32xf32>
    %c0_30 = arith.constant 0 : index
    %c0_31 = arith.constant 0 : index
    %53 = vector.load %arg11[%c0_30, %c0_31] : memref<16x32xf32, #tpu.memory_space<vmem>>, vector<16x32xf32>
    %cst_32 = arith.constant dense<0.000000e+00> : vector<8x32xf32>
    %54 = tpu.matmul %0, %53, %cst_32 {dimension_numbers = #tpu.dot_dimension_numbers<[1], [0], [0], [1], [0, 0, 1, 1], [], []>} : vector<8x16xf32>, vector<16x32xf32>, vector<8x32xf32> -> vector<8x32xf32>
    %55 = arith.addf %52, %54 : vector<8x32xf32>
    %c0_33 = arith.constant 0 : index
    %c0_34 = arith.constant 0 : index
    %56 = vector.load %arg12[%c0_33, %c0_34] : memref<1x32xf32, #tpu.memory_space<vmem>>, vector<1x32xf32>
    %57 = vector.broadcast %56 : vector<1x32xf32> to vector<8x32xf32>
    %58 = arith.addf %55, %57 : vector<8x32xf32>
    %cst_35 = arith.constant 0.000000e+00 : f32
    %59 = vector.broadcast %cst_35 : f32 to vector<8x32xf32>
    %60 = arith.maximumf %58, %59 : vector<8x32xf32>
    %cst_36 = arith.constant dense<0.000000e+00> : vector<8xf32>
    %61 = vector.multi_reduction <add>, %60, %cst_36 [1] : vector<8x32xf32> to vector<8xf32>
    %62 = vector.shape_cast %61 : vector<8xf32> to vector<8x1xf32>
    %cst_37 = arith.constant 3.200000e+01 : f32
    %63 = vector.broadcast %cst_37 : f32 to vector<8x1xf32>
    %64 = arith.divf %62, %63 : vector<8x1xf32>
    %65 = vector.broadcast %64 : vector<8x1xf32> to vector<8x32xf32>
    %66 = arith.subf %60, %65 : vector<8x32xf32>
    %67 = arith.mulf %66, %66 : vector<8x32xf32>
    %cst_38 = arith.constant dense<0.000000e+00> : vector<8xf32>
    %68 = vector.multi_reduction <add>, %67, %cst_38 [1] : vector<8x32xf32> to vector<8xf32>
    %69 = vector.shape_cast %68 : vector<8xf32> to vector<8x1xf32>
    %cst_39 = arith.constant 3.200000e+01 : f32
    %70 = vector.broadcast %cst_39 : f32 to vector<8x1xf32>
    %71 = arith.divf %69, %70 : vector<8x1xf32>
    %72 = vector.broadcast %64 : vector<8x1xf32> to vector<8x32xf32>
    %73 = arith.subf %60, %72 : vector<8x32xf32>
    %cst_40 = arith.constant 9.99999974E-6 : f32
    %74 = vector.broadcast %cst_40 : f32 to vector<8x1xf32>
    %75 = arith.addf %71, %74 : vector<8x1xf32>
    %76 = math.rsqrt %75 : vector<8x1xf32>
    %77 = vector.broadcast %76 : vector<8x1xf32> to vector<8x32xf32>
    %78 = arith.mulf %73, %77 : vector<8x32xf32>
    %c0_41 = arith.constant 0 : index
    %c0_42 = arith.constant 0 : index
    %79 = vector.load %arg13[%c0_41, %c0_42] : memref<1x32xf32, #tpu.memory_space<vmem>>, vector<1x32xf32>
    %80 = vector.broadcast %79 : vector<1x32xf32> to vector<8x32xf32>
    %81 = arith.mulf %78, %80 : vector<8x32xf32>
    %c0_43 = arith.constant 0 : index
    %c0_44 = arith.constant 0 : index
    %82 = vector.load %arg14[%c0_43, %c0_44] : memref<1x32xf32, #tpu.memory_space<vmem>>, vector<1x32xf32>
    %83 = vector.broadcast %82 : vector<1x32xf32> to vector<8x32xf32>
    %84 = arith.addf %81, %83 : vector<8x32xf32>
    %c0_45 = arith.constant 0 : index
    %c0_46 = arith.constant 0 : index
    %85 = vector.load %arg16[%c0_45, %c0_46] : memref<8x32xf32, #tpu.memory_space<vmem>>, vector<8x32xf32>
    tpu.vector_store %arg16[%c0_45, %c0_46], %84 {strides = array<i32>} : memref<8x32xf32, #tpu.memory_space<vmem>>, vector<8x32xf32>,
    return
  }
  func.func @transform_0(%arg0: i32) -> (i32, i32) {
    %c0_i32 = arith.constant 0 : i32
    %c0_i32_0 = arith.constant 0 : i32
    return %arg0, %c0_i32 : i32, i32
  }
  func.func @transform_1(%arg0: i32) -> (i32, i32) {
    %c0_i32 = arith.constant 0 : i32
    %c0_i32_0 = arith.constant 0 : i32
    return %arg0, %c0_i32 : i32, i32
  }
  func.func @transform_2(%arg0: i32) -> (i32, i32) {
    %c0_i32 = arith.constant 0 : i32
    %c0_i32_0 = arith.constant 0 : i32
    %c0_i32_1 = arith.constant 0 : i32
    return %c0_i32, %c0_i32_0 : i32, i32
  }
  func.func @transform_3(%arg0: i32) -> (i32, i32) {
    %c0_i32 = arith.constant 0 : i32
    %c0_i32_0 = arith.constant 0 : i32
    %c0_i32_1 = arith.constant 0 : i32
    return %c0_i32, %c0_i32_0 : i32, i32
  }
  func.func @transform_4(%arg0: i32) -> (i32, i32) {
    %c0_i32 = arith.constant 0 : i32
    %c0_i32_0 = arith.constant 0 : i32
    %c0_i32_1 = arith.constant 0 : i32
    return %c0_i32, %c0_i32_0 : i32, i32
  }
  func.func @transform_5(%arg0: i32) -> (i32, i32) {
    %c0_i32 = arith.constant 0 : i32
    %c0_i32_0 = arith.constant 0 : i32
    %c0_i32_1 = arith.constant 0 : i32
    return %c0_i32, %c0_i32_0 : i32, i32
  }
  func.func @transform_6(%arg0: i32) -> (i32, i32) {
    %c0_i32 = arith.constant 0 : i32
    %c0_i32_0 = arith.constant 0 : i32
    %c0_i32_1 = arith.constant 0 : i32
    return %c0_i32, %c0_i32_0 : i32, i32
  }
  func.func @transform_7(%arg0: i32) -> (i32, i32) {
    %c0_i32 = arith.constant 0 : i32
    %c0_i32_0 = arith.constant 0 : i32
    %c0_i32_1 = arith.constant 0 : i32
    return %c0_i32, %c0_i32_0 : i32, i32
  }
  func.func @transform_8(%arg0: i32) -> (i32, i32) {
    %c0_i32 = arith.constant 0 : i32
    %c0_i32_0 = arith.constant 0 : i32
    %c0_i32_1 = arith.constant 0 : i32
    return %c0_i32, %c0_i32_0 : i32, i32
  }
  func.func @transform_9(%arg0: i32) -> (i32, i32) {
    %c0_i32 = arith.constant 0 : i32
    %c0_i32_0 = arith.constant 0 : i32
    %c0_i32_1 = arith.constant 0 : i32
    return %c0_i32, %c0_i32_0 : i32, i32
  }
  func.func @transform_10(%arg0: i32) -> (i32, i32) {
    %c0_i32 = arith.constant 0 : i32
    %c0_i32_0 = arith.constant 0 : i32
    %c0_i32_1 = arith.constant 0 : i32
    return %c0_i32, %c0_i32_0 : i32, i32
  }
  func.func @transform_11(%arg0: i32) -> (i32, i32) {
    %c0_i32 = arith.constant 0 : i32
    %c0_i32_0 = arith.constant 0 : i32
    %c0_i32_1 = arith.constant 0 : i32
    return %c0_i32, %c0_i32_0 : i32, i32
  }
  func.func @transform_12(%arg0: i32) -> (i32, i32) {
    %c0_i32 = arith.constant 0 : i32
    %c0_i32_0 = arith.constant 0 : i32
    %c0_i32_1 = arith.constant 0 : i32
    return %c0_i32, %c0_i32_0 : i32, i32
  }
  func.func @transform_13(%arg0: i32) -> (i32, i32) {
    %c0_i32 = arith.constant 0 : i32
    %c0_i32_0 = arith.constant 0 : i32
    %c0_i32_1 = arith.constant 0 : i32
    return %c0_i32, %c0_i32_0 : i32, i32
  }
  func.func @transform_14(%arg0: i32) -> (i32, i32) {
    %c0_i32 = arith.constant 0 : i32
    %c0_i32_0 = arith.constant 0 : i32
    %c0_i32_1 = arith.constant 0 : i32
    return %c0_i32, %c0_i32_0 : i32, i32
  }
  func.func @transform_15(%arg0: i32) -> (i32, i32) {
    %c0_i32 = arith.constant 0 : i32
    %c0_i32_0 = arith.constant 0 : i32
    return %arg0, %c0_i32 : i32, i32
  }
}

</mosaic_0001>

<bundles_post_ra>
// kernel: tpu_custom_call.1
= control target key start
LH: loop header
LB: loop body
LE: loop exit
PB: predicated region body
PF: predicated region fallthrough
CT: control target
= control target key end

     0   :  { %s4399_s0 = inlined_call_operand.vmem [shape: f32[16,16], index: 0, kind: input, shape index: {}]   ;;  %s4400_s1 = inlined_call_operand.vmem [shape: f32[128,32], index: 1, kind: input, shape index: {}]   ;;  %s4401_s2 = inlined_call_operand.vmem [shape: f32[1,8], index: 2, kind: input, shape index: {}]   ;;  %s4402_s3 = inlined_call_operand.vmem [shape: f32[1,8], index: 3, kind: input, shape index: {}]   ;;  %s4403_s4 = inlined_call_operand.vmem [shape: f32[16,32], index: 4, kind: input, shape index: {}]   ;;  %s4404_s5 = inlined_call_operand.vmem [shape: f32[1,32], index: 5, kind: input, shape index: {}]   ;;  %s4405_s6 = inlined_call_operand.vmem [shape: f32[32,64], index: 6, kind: input, shape index: {}]   ;;  %s4406_s7 = inlined_call_operand.vmem [shape: f32[8,64], index: 7, kind: input, shape index: {}]   ;;  %s4407_s8 = inlined_call_operand.vmem [shape: f32[1,64], index: 8, kind: input, shape index: {}]   ;;  %s4408_s9 = inlined_call_operand.vmem [shape: f32[32,32], index: 9, kind: input, shape index: {}]   ;;  %s4409_s10 = inlined_call_operand.vmem [shape: f32[16,32], index: 10, kind: input, shape index: {}]   ;;  %s4410_s11 = inlined_call_operand.vmem [shape: f32[1,32], index: 11, kind: input, shape index: {}]   ;;  %s4411_s12 = inlined_call_operand.vmem [shape: f32[1,32], index: 12, kind: input, shape index: {}]   ;;  %s4412_s13 = inlined_call_operand.vmem [shape: f32[1,32], index: 13, kind: input, shape index: {}]   ;;  %s4413_s14 = inlined_call_operand.vmem [shape: f32[32,32], index: 14, kind: input, shape index: {}]   ;;  %s4414_s15 = inlined_call_operand.hbm [shape: f32[16,32], index: 15, kind: output, shape index: {}]  }
   0x1   :  { %4451 = sst [smem:[#allocation20_spill]] %s4399_s0 }
   0x2   :  { %4452 = sst [smem:[#allocation21_spill]] %s4400_s1 }
   0x3   :  { %4453 = sst [smem:[#allocation22_spill]] %s4401_s2 }
   0x4   :  { %4454 = sst [smem:[#allocation23_spill]] %s4402_s3 }
   0x5   :  { %20 = vsyncpa [#allocation3], 0 }
   0x6   :  { %22 = vsyncpa [#allocation3 + $0x1], 0  ;;  %s3129_s18 = smov 0   ;;  %s3131_s19 = smov 0  }
   0x7   :  { %s3133_s20 = smov 0   ;;  %s3135_s21 = smov 0  }
   0x8 LB: > { %4455 = sst [smem:[#allocation5_spill]] %s3029_s20  ;;  %s3150_s22 = sadd.s32 4294967295, %s3033_s21   ;;  %s3033_s21 = sphi %s3135_s21, %s4526_s21   ;;  %s3029_s20 = sphi %s3133_s20, %s4525_s20   ;;  %s3025_s19 = sphi %s3131_s19, %s4524_s19   ;;  %s3021_s18 = sphi %s3129_s18, %s4523_s18  }
   0x9   : > { %s2571_s23 = sadd.s32 4294967294, %s3033_s21   ;;  %s3154_s24 = sadd.s32 1, %s3033_s21  }
   0xa   : > { %s360_s25 = sadd.s32 1, %s3029_s20  ;;  %s357_s26 = ssub.s32 %s3033_s21, %s3154_s24 }
   0xb   : > { %p370_p0 = scmp.ne.s32.totalorder %s3029_s20, %s3025_s19  ;;  %p358_p1 = scmp.eq.s32.totalorder %s357_s26, 0 }
   0xc   : > { %p371_p2 = scmp.eq.s32.totalorder %s3150_s22, 1  ;;  %p376_p3 = scmp.ne.s32.totalorder %s3025_s19, %s3021_s18 }
   0xd   : > { %p377_p4 = scmp.eq.s32.totalorder %s2571_s23, 1  ;;  %p2574_p7 = scmp.ge.s32.totalorder %s3033_s21, 1 }
   0xe   : > { %s3165_s27 = scalar_select %p358_p1, %s3029_s20, %s360_s25  }
   0xf   : > { %p3167_p5 = por %p371_p2, %p370_p0  ;;  %p3171_p6 = por %p377_p4, %p376_p3 }
  0x10   : > { %4456 = sst [smem:[#allocation6_spill]] %s3165_s27  ;;  %p450_p8 = scmp.lt.s32.totalorder %s3033_s21, 3 }
  0x12   : > { %p451_p9 = pnand %p2574_p7, %p450_p8 }
  0x14   : > { %454 = sbr.rel (%p451_p9) target bundleno = 1693 (0x69d), region = 80 }
  0x1b   : > { %s2577_s30 = sshll.u32 %s3150_s22, 3  ;;  %v3035_v0 = vmov 24   ;;  %s4459_s1 = sld [smem:[#allocation21_spill]]  ;;  %v3194_v9 = vld [vmem:[%s4406_s7] sm:$0xff]  ;;  %v1416_v11 = vld [vmem:[%s4403_s4 + $0x8] sm:$0xff]  ;;  %v4418_v12 = vmov 0.0|0.0  }
  0x1c   : > { %2895 = vset.pattern.permute.xlu1 %v3035_v0  ;;  %2894 = vset.pattern.permute.xlu0 %v3035_v0  ;;  %p507_p10 = scmp.lt.s32.totalorder %s2577_s30, 15  ;;  %v1415_v10 = vld [vmem:[%s4403_s4] sm:$0xff]  ;;  %v1499_v15 = vld [vmem:[%s4405_s6 + $0x8] sm:$0xff]  ;;  %s4460_s2 = sld [smem:[#allocation22_spill]]  ;;  %vm3037_vm0 = vmmov 0   ;;  %v4416_v18 = vmov 0.0  }
  0x1d   : > { %2772 = vmatprep.subr.bf16.mxu0 %v4418_v12  ;;  %2800 = vmatprep.subr.mxu1 %v3194_v9  ;;  %v2773_v13 = vpack.c.bf16 %v1416_v11, %v1415_v10  ;;  %v1498_v14 = vld [vmem:[%s4405_s6] sm:$0xff]  ;;  %s4462_s3 = sld [smem:[#allocation23_spill]]  ;;  %p502_p11 = scmp.lt.s32.totalorder %s3150_s22, 1 }
  0x1e   : > { %s4528_s30 = smov (!%p507_p10, %s2577_s30), 15  ;;  %2801 = vmatpush3.msra.mxu1 %v3194_v9  ;;  %v3216_v17 = vpack.c.bf16 %v1499_v15, %v1498_v14  ;;  %2697 = vmatprep.mubr.msk.f32.mxu0 %vm3037_vm0, %v4416_v18  ;;  %s4482_s0 = sld [smem:[#allocation20_spill]] }
  0x1f   : > { %s2578_s16 = sshll.u32 %s4528_s30, 3  ;;  %2774 = vmatpush3.bf16.msra.mxu0 %v2773_v13  ;;  %s3046_s17 = smov 32  }
  0x20   : > { %4461 = vst [vmem:[#allocation7_spill] sm:$0xff] %v3216_v17  ;;  %2776 = vmatprep.subr.bf16.mxu1 %v3216_v17  ;;  %2700 = vmatprep.subr.mxu0 %v3194_v9  ;;  %s3516_s27 = scalar_select %p502_p11, %s3150_s22, 1 }
  0x21   : > { %s3181_s25 = scalar_lea.vmem %s4459_s1, %s2578_s16  ;;  %s2646_s30 = sshll.u32 %s3150_s22, 7 }
  0x22   : > { %v519_v1 = vld [vmem:[%s3181_s25 + $0x30] sm:$0xff]  ;;  %v517_v2 = vld [vmem:[%s3181_s25 + $0x20] sm:$0xff]  ;;  %v520_v3 = vld [vmem:[%s3181_s25 + $0x38] sm:$0xff]  ;;  %s2576_s23 = sshll.u32 %s3516_s27, 3  ;;  %s3048_s22 = smov [#allocation2]  }
  0x23   : > { %554 = vperm.xlu1 %2895, %v519_v1   ;;  %544 = vperm.xlu0 %2894, %v517_v2   ;;  %v518_v4 = vld [vmem:[%s3181_s25 + $0x28] sm:$0xff]  ;;  %v513_v6 = vld [vmem:[%s3181_s25] sm:$0xff]  ;;  %v516_v7 = vld [vmem:[%s3181_s25 + $0x18] sm:$0xff] }
  0x24   : > { %v514_v5 = vld [vmem:[%s3181_s25 + $0x8] sm:$0xff]  ;;  %v515_v8 = vld [vmem:[%s3181_s25 + $0x10] sm:$0xff]  ;;  %v3213_v16 = vld [vmem:[%s4460_s2] ss:$0 sm:$0xff]  ;;  %s3554_s16 = scalar_lea.vmem %s4482_s0, %s2576_s23  ;;  %s3047_s0 = smov 96  }
  0x25   : > { %v3223_v19 = vld [vmem:[%s4462_s3] ss:$0 sm:$0xff]  ;;  %s4356_s3 = scalar_lea.hbm %s4414_s15, %s2646_s30 }
  0x27   : > { %559 = vperm.xlu1 %2895, %v520_v3   ;;  %549 = vperm.xlu0 %2894, %v518_v4  }
  0x2b   : > { %529 = vperm.xlu1 %2895, %v514_v5   ;;  %524 = vperm.xlu0 %2894, %v513_v6   ;;  %v4430_v5 = vmov 920167782  }
  0x2f   : > { %539 = vperm.xlu1 %2895, %v516_v7   ;;  %534 = vperm.xlu0 %2894, %v515_v8   ;;  %v4432_v7 = vmov 1326507024  }
  0xa2   : > { %v555_v20 = vpop.permute.xlu1 %554  ;;  %v545_v21 = vpop.permute.xlu0 %544 }
  0xa3   : > { %v574_v22 = vmul.f32 %v3213_v16, %v555_v20  ;;  %v572_v23 = vmul.f32 %v3213_v16, %v545_v21 }
  0xa5   : > { %v3230_v24 = vadd.f32 %v3223_v19, %v574_v22  ;;  %v3233_v25 = vadd.f32 %v3223_v19, %v572_v23  ;;  %v4433_v22 = vmov 2102212464  }
  0xa6   : > { %v560_v26 = vpop.permute.xlu1 %559  ;;  %v550_v27 = vpop.permute.xlu0 %549 }
  0xa7   : > { %v1212_v28 = vand.u32 2139095040, %v3230_v24  ;;  %v575_v29 = vmul.f32 %v3213_v16, %v560_v26  ;;  %v573_v30 = vmul.f32 %v3213_v16, %v550_v27  ;;  %v1006_v31 = vand.u32 2139095040, %v3233_v25 }
  0xa8   : > { %v4421_v47 = vand.u32 2147483647, %v3233_v25 }
  0xa9   : > { %v1213_v32 = vshrl.u32 %v1212_v28, 23  ;;  %v3240_v33 = vadd.f32 %v3223_v19, %v575_v29  ;;  %v3243_v34 = vadd.f32 %v3223_v19, %v573_v30  ;;  %v1007_v39 = vshrl.u32 %v1006_v31, 23 }
  0xaa   : > { %v530_v35 = vpop.permute.xlu1 %529  ;;  %v525_v49 = vpop.permute.xlu0 %524  ;;  %v1010_v54 = vand.u32 8388607, %v4421_v47 }
  0xab   : > { %4463 = vst [vmem:[#allocation8_spill] sm:$0xff] %v3240_v33  ;;  %v2605_v36 = vadd.s32 4294967169, %v1213_v32  ;;  %v1315_v37 = vand.u32 2139095040, %v3240_v33  ;;  %v1109_v38 = vand.u32 2139095040, %v3243_v34  ;;  %v569_v40 = vmul.f32 %v3213_v16, %v530_v35 }
  0xac   : > { %v2597_v48 = vadd.s32 4294967169, %v1007_v39  ;;  %v568_v57 = vmul.f32 %v3213_v16, %v525_v49  ;;  %v1011_v63 = vor.u32 8388608, %v1010_v54 }
  0xad   : > { %v1219_v41 = vadd.s32 1, %v2605_v36  ;;  %v1316_v42 = vshrl.u32 %v1315_v37, 23  ;;  %v1110_v43 = vshrl.u32 %v1109_v38, 23  ;;  %v3249_v44 = vadd.f32 %v3223_v19, %v569_v40 }
  0xae   : > { %v1013_v55 = vadd.s32 1, %v2597_v48  ;;  %v3265_v1 = vadd.f32 %v3223_v19, %v568_v57  ;;  %v540_v3 = vpop.permute.xlu1 %539  ;;  %v535_v13 = vpop.permute.xlu0 %534  ;;  %v3283_v20 = vshll.u32 %v1011_v63, 8 }
  0xaf   : > { %vm1220_vm1 = vcmp.gt.s32.totalorder %v1219_v41, 0  ;;  %v2609_v45 = vadd.s32 4294967169, %v1316_v42  ;;  %v2601_v46 = vadd.s32 4294967169, %v1110_v43  ;;  %v697_v52 = vand.u32 2139095040, %v3249_v44 }
  0xb0   : > { %v1221_v50 = vsel %vm1220_vm1, %v1219_v41, 0  ;;  %v4420_v61 = vand.u32 2147483647, %v3249_v44  ;;  %vm1014_vm4 = vcmp.gt.s32.totalorder %v1013_v55, 0  ;;  %v594_v27 = vand.u32 2139095040, %v3265_v1 }
  0xb1   : > { %v1322_v51 = vadd.s32 1, %v2609_v45  ;;  %v1116_v53 = vadd.s32 1, %v2601_v46  ;;  %v698_v56 = vshrl.u32 %v697_v52, 23  ;;  %v3256_v58 = vand.u32 31, %v1221_v50 }
  0xb2   : > { %v701_v11 = vand.u32 8388607, %v4420_v61  ;;  %v1015_v14 = vsel %vm1014_vm4, %v1013_v55, 0  ;;  %v571_v28 = vmul.f32 %v3213_v16, %v540_v3  ;;  %v570_v31 = vmul.f32 %v3213_v16, %v535_v13 }
  0xb3   : > { %vm1323_vm2 = vcmp.gt.s32.totalorder %v1322_v51, 0  ;;  %vm1117_vm3 = vcmp.gt.s32.totalorder %v1116_v53, 0  ;;  %v2585_v62 = vadd.s32 4294967169, %v698_v56  ;;  %v3268_v2 = vsub.s32 32, %v3256_v58 }
  0xb4   : > { %v1324_v59 = vsel %vm1323_vm2, %v1322_v51, 0  ;;  %v3279_v10 = vsel %vm1117_vm3, %v1116_v53, 0  ;;  %v1235_v23 = vshll.u32 %v4433_v22, %v3256_v58  ;;  %v3298_v32 = vshrl.u32 %v1221_v50, 5 }
  0xb5   : > { %v3258_v60 = vand.u32 31, %v1324_v59  ;;  %v704_v15 = vadd.s32 1, %v2585_v62  ;;  %v1236_v29 = vshrl.u32 %v4430_v5, %v3268_v2  ;;  %v3295_v30 = vand.u32 31, %v3279_v10 }
  0xb6   : > { %v702_v35 = vor.u32 8388608, %v701_v11  ;;  %v595_v37 = vshrl.u32 %v594_v27, 23  ;;  %v3302_v38 = vshll.u32 %v4430_v5, %v3256_v58  ;;  %v3304_v39 = vshrl.u32 %v1015_v14, 5 }
  0xb7   : > { %4464 = vst [vmem:[#allocation9_spill] sm:$0xff] %v3258_v60  ;;  %v3262_v0 = vsub.s32 32, %v3258_v60  ;;  %v3273_v6 = vshll.u32 %v4430_v5, %v3258_v60  ;;  %vm705_vm5 = vcmp.gt.s32.totalorder %v704_v15, 0  ;;  %v3306_v40 = vand.u32 31, %v1015_v14 }
  0xb8   : > { %v706_v36 = vsel %vm705_vm5, %v704_v15, 0  ;;  %v3310_v42 = vshrl.u32 %v4432_v7, %v3268_v2  ;;  %v3312_v43 = vshrl.u32 %v1324_v59, 5  ;;  %v3315_v16 = vadd.f32 %v3223_v19, %v571_v28 }
  0xb9   : > { %4465 = vst [vmem:[#allocation10_spill] sm:$0xff] %v3262_v0  ;;  %v3277_v8 = vshrl.u32 %v4432_v7, %v3262_v0  ;;  %v708_v41 = vand.u32 31, %v706_v36  ;;  %v3318_v45 = vadd.f32 %v3223_v19, %v570_v31  ;;  %v3320_v46 = vor.u32 %v1236_v29, %v1235_v23 }
  0xba   : > { %4466 = vst [vmem:[#allocation11_spill] sm:$0xff] %v3312_v43  ;;  %4467 = vst [vmem:[#allocation12_spill] sm:$0xff] %v3315_v16  ;;  %v3323_v48 = vsub.s32 32, %v3295_v30  ;;  %v707_v49 = vshrl.u32 %v706_v36, 5  ;;  %v4426_v51 = vmov 683565275   ;;  %v1029_v47 = vshll.u32 %v4433_v22, %v3306_v40 }
  0xbb   : > { %v1343_v26 = vor.u32 %v3277_v8, %v3273_v6  ;;  %4468 = vst [vmem:[#allocation13_spill] sm:$0xff] %v3318_v45  ;;  %v709_v50 = vsub.s32 32, %v708_v41  ;;  %v711_v52 = vshll.u32 %v4426_v51, %v708_v41  ;;  %v4424_v53 = vmov 2475754826  }
  0xbc   : > { %v714_v54 = vshll.u32 %v4424_v53, %v708_v41  ;;  %v3327_v55 = vshll.u32 %v702_v35, 8  ;;  %v2581_v56 = vadd.s32 4294967169, %v595_v37  ;;  %v4422_v19 = vmov 2131351028  }
  0xbd   : > { %v712_v57 = vshrl.u32 %v4424_v53, %v709_v50  ;;  %v715_v59 = vshrl.u32 %v4422_v19, %v709_v50  ;;  %v717_v62 = vshll.u32 %v4422_v19, %v708_v41  ;;  %v718_v63 = vshrl.u32 %v4433_v22, %v709_v50 }
  0xbe   : > { %v720_v3 = vshll.u32 %v4433_v22, %v708_v41  ;;  %v721_v11 = vshrl.u32 %v4430_v5, %v709_v50  ;;  %v723_v13 = vshll.u32 %v4430_v5, %v708_v41  ;;  %v724_v14 = vshrl.u32 %v4432_v7, %v709_v50 }
  0xbf   : > { %vm1244_vm6 = vcmp.lt.s32.totalorder %v3298_v32, 4  ;;  %v713_v15 = vor.u32 %v712_v57, %v711_v52  ;;  %v716_v23 = vor.u32 %v715_v59, %v714_v54  ;;  %v719_v27 = vor.u32 %v718_v63, %v717_v62 }
  0xc0   : > { %vm726_vm7 = vcmp.lt.s32.totalorder %v707_v49, 1  ;;  %v710_v28 = vshrl.u32 %v4426_v51, %v709_v50  ;;  %v722_v29 = vor.u32 %v721_v11, %v720_v3  ;;  %v725_v31 = vor.u32 %v724_v14, %v723_v13 }
  0xc1   : > { %vm729_vm8 = vcmp.lt.s32.totalorder %v707_v49, 4  ;;  %vm728_vm9 = vcmp.lt.s32.totalorder %v707_v49, 3  ;;  %v734_v36 = vsel %vm726_vm7, %v713_v15, %v716_v23  ;;  %v738_v37 = vsel %vm726_vm7, %v716_v23, %v719_v27 }
  0xc2   : > { %v731_v35 = vsel %vm729_vm8, %v719_v27, 2102212464  ;;  %v735_v41 = vsel %vm729_vm8, %v722_v29, 920167782  ;;  %v739_v18 = vsel %vm729_vm8, %v725_v31, 1326507024  ;;  %v730_v50 = vsel %vm726_vm7, %v710_v28, %v713_v15 }
  0xc3   : > { %v903_v12 = vand.u32 2139095040, %v3315_v16  ;;  %v800_v52 = vand.u32 2139095040, %v3318_v45  ;;  %vm727_vm10 = vcmp.lt.s32.totalorder %v707_v49, 2  ;;  %v736_v54 = vsel %vm728_vm9, %v719_v27, %v735_v41 }
  0xc4   : > { %v740_v57 = vsel %vm728_vm9, %v722_v29, %v739_v18  ;;  %v601_v59 = vadd.s32 1, %v2581_v56  ;;  %v732_v62 = vsel %vm728_vm9, %v716_v23, %v731_v35  ;;  %v737_v63 = vsel %vm727_vm10, %v734_v36, %v736_v54 }
  0xc5   : > { %v741_v3 = vsel %vm727_vm10, %v738_v37, %v740_v57  ;;  %v3351_v14 = vmul.u32.u64.low %v3327_v55, %v737_v63  ;;  %v3352_v31 = vmul.u32.u64.high %v3327_v55, %v737_v63, %v3351_v14  ;;  %v3356_v27 = vsub.s32 32, %v3306_v40 }
  0xc6   : > { %v3347_v11 = vmul.u32.u64.low %v3327_v55, %v741_v3  ;;  %v3348_v13 = vmul.u32.u64.high %v3327_v55, %v741_v3, %v3347_v11  ;;  %v1339_v18 = vshrl.u32 %v4430_v5, %v3262_v0  ;;  %v904_v56 = vshrl.u32 %v903_v12, 23 }
  0xc7   : > { %v801_v15 = vshrl.u32 %v800_v52, 23  ;;  %v1240_v23 = vor.u32 %v3310_v42, %v3302_v38  ;;  %v1338_v28 = vshll.u32 %v4433_v22, %v3258_v60  ;;  %v3365_v29 = vshrl.u32 %v3279_v10, 5 }
  0xc8   : > { %v733_v35 = vsel %vm727_vm10, %v730_v50, %v732_v62  ;;  %v3371_v36 = vsel %vm1244_vm6, %v3320_v46, 920167782  ;;  %vm1347_vm11 = vcmp.lt.s32.totalorder %v3312_v43, 4  ;;  %v1133_v12 = vshrl.u32 %v4430_v5, %v3323_v48 }
  0xc9   : > { %v2593_v37 = vadd.s32 4294967169, %v904_v56  ;;  %vm751_vm12 = vc.u32 %v3348_v13, %v3351_v14  ;;  %v752_v38 = vadd.s32 1, %v3352_v31  ;;  %vm602_vm13 = vcmp.gt.s32.totalorder %v601_v59, 0 }
  0xca   : > { %v2589_v10 = vadd.s32 4294967169, %v801_v15  ;;  %v3379_v42 = vor.u32 %v1339_v18, %v1338_v28  ;;  %v1136_v49 = vshrl.u32 %v4432_v7, %v3323_v48  ;;  %v749_v41 = vmul.u32 %v3327_v55, %v733_v35 }
  0xcb   : > { %v910_v52 = vadd.s32 1, %v2593_v37  ;;  %v3386_v54 = vsel %vm1244_vm6, %v1240_v23, 1326507024  ;;  %v1132_v57 = vshll.u32 %v4433_v22, %v3295_v30  ;;  %v753_v50 = vsel %vm751_vm12, %v752_v38, %v3352_v31 }
  0xcc   : > { %4469 = vst [vmem:[#allocation14_spill] sm:$0xff] %v3379_v42  ;;  %v807_v62 = vadd.s32 1, %v2589_v10  ;;  %v1135_v63 = vshll.u32 %v4430_v5, %v3295_v30  ;;  %v754_v3 = vadd.s32 %v753_v50, %v749_v41  ;;  %v603_v11 = vsel %vm602_vm13, %v601_v59, 0 }
  0xcd   : > { %vm911_vm14 = vcmp.gt.s32.totalorder %v910_v52, 0  ;;  %v3393_v18 = vor.u32 %v1133_v12, %v1132_v57  ;;  %vm1141_vm15 = vcmp.lt.s32.totalorder %v3365_v29, 4  ;;  %v3401_v56 = vsel %vm1347_vm11, %v3379_v42, 920167782 }
  0xce   : > { %v3396_v55 = vsel %vm911_vm14, %v910_v52, 0  ;;  %vm808_vm1 = vcmp.gt.s32.totalorder %v807_v62, 0  ;;  %4470 = vst [vmem:[#allocation15_spill] sm:$0xff] %v3401_v56  ;;  %v1137_v31 = vor.u32 %v1136_v49, %v1135_v63  ;;  %v755_v15 = vadd.s32 536870912, %v754_v3 }
  0xcf   : > { %v1021_v23 = vshrl.u32 %v4424_v53, %v3356_v27  ;;  %v3410_v59 = vsel %vm1347_vm11, %v1343_v26, 1326507024  ;;  %v3412_v28 = vand.u32 31, %v603_v11  ;;  %v3415_v35 = vand.u32 31, %v3396_v55 }
  0xd0   : > { %4471 = vst [vmem:[#allocation16_spill] sm:$0xff] %v3410_v59  ;;  %v3417_v12 = vsel %vm808_vm1, %v807_v62, 0  ;;  %v3419_v37 = vshrl.u32 %v755_v15, 30  ;;  %v1020_v10 = vshll.u32 %v4426_v51, %v3306_v40  ;;  %v1023_v6 = vshll.u32 %v4424_v53, %v3306_v40 }
  0xd1   : > { %v3422_v38 = vand.u32 31, %v3417_v12  ;;  %v3429_v8 = vsub.s32 32, %v3415_v35  ;;  %v1024_v26 = vshrl.u32 %v4422_v19, %v3356_v27  ;;  %v1027_v49 = vshrl.u32 %v4433_v22, %v3356_v27 }
  0xd2   : > { %4472 = vst [vmem:[#allocation17_spill] sm:$0xff] %v3419_v37  ;;  %v1030_v41 = vshrl.u32 %v4430_v5, %v3356_v27  ;;  %v757_v52 = vshll.u32 %v3419_v37, 30  ;;  %v1022_v50 = vor.u32 %v1021_v23, %v1020_v10  ;;  %v1026_v62 = vshll.u32 %v4422_v19, %v3306_v40 }
  0xd3   : > { %v3439_v57 = vsub.s32 32, %v3422_v38  ;;  %v3445_v63 = vshll.u32 %v4430_v5, %v3415_v35  ;;  %v3449_v15 = vshrl.u32 %v4432_v7, %v3429_v8  ;;  %v3453_v61 = vshll.u32 %v4430_v5, %v3422_v38 }
  0xd4   : > { %v3457_v4 = vsub.s32 %v754_v3, %v757_v52  ;;  %v1032_v10 = vshll.u32 %v4430_v5, %v3306_v40  ;;  %v1033_v21 = vshrl.u32 %v4432_v7, %v3356_v27  ;;  %v1025_v53 = vor.u32 %v1024_v26, %v1023_v6 }
  0xd5   : > { %4473 = vst [vmem:[#allocation18_spill] sm:$0xff] %v3453_v61  ;;  %v3461_v23 = vshrl.u32 %v4432_v7, %v3439_v57  ;;  %v1028_v51 = vor.u32 %v1027_v49, %v1026_v62  ;;  %v1031_v16 = vor.u32 %v1030_v41, %v1029_v47  ;;  %v3472_v3 = vsel %vm1141_vm15, %v3393_v18, 920167782 }
  0xd6   : > { %v760_v52 = vsub.s32 0, %v3457_v4  ;;  %v1034_v5 = vor.u32 %v1033_v21, %v1032_v10  ;;  %v3479_v7 = vsel %vm1141_vm15, %v1137_v31, 1326507024  ;;  %v3481_v19 = vshrl.u32 %v603_v11, 5 }
  0xd7   : > { %4474 = vst [vmem:[#allocation19_spill] sm:$0xff] %v3461_v23  ;;  %v3484_v47 = vsub.s32 32, %v3412_v28  ;;  %v4475_v6 = vmov 683565275   ;;  %vm1035_vm2 = vcmp.lt.s32.totalorder %v3304_v39, 1  ;;  %vm1037_vm3 = vcmp.lt.s32.totalorder %v3304_v39, 3 }
  0xd8   : > { %v1019_v26 = vshrl.u32 %v4475_v6, %v3356_v27  ;;  %v2586_v49 = vmin.u32 %v760_v52, %v3457_v4  ;;  %vm1038_vm4 = vcmp.lt.s32.totalorder %v3304_v39, 4  ;;  %v1043_v41 = vsel %vm1035_vm2, %v1022_v50, %v1025_v53 }
  0xd9   : > { %v1040_v21 = vsel %vm1038_vm4, %v1028_v51, 2102212464  ;;  %v1044_v31 = vsel %vm1038_vm4, %v1031_v16, 920167782  ;;  %v1047_v62 = vsel %vm1035_vm2, %v1025_v53, %v1028_v51  ;;  %vm1036_vm5 = vcmp.lt.s32.totalorder %v3304_v39, 2 }
  0xda   : > { %v762_v11 = vclz %v2586_v49  ;;  %v1045_v10 = vsel %vm1037_vm3, %v1028_v51, %v1044_v31  ;;  %v1048_v27 = vsel %vm1038_vm4, %v1034_v5, 1326507024  ;;  %v1039_v40 = vsel %vm1035_vm2, %v1019_v26, %v1022_v50 }
  0xdb   : > { %v1041_v52 = vsel %vm1037_vm3, %v1025_v53, %v1040_v21  ;;  %v1046_v22 = vsel %vm1036_vm5, %v1043_v41, %v1045_v10  ;;  %v1049_v61 = vsel %vm1037_vm3, %v1031_v16, %v1048_v27  ;;  %v4476_v49 = vmov 2102212464  }
  0xdc   : > { %v2587_v23 = vadd.s32 4294967294, %v762_v11  ;;  %v1050_v45 = vsel %vm1036_vm5, %v1047_v62, %v1049_v61  ;;  %v3499_v17 = vmul.u32.u64.low %v3283_v20, %v1046_v22  ;;  %v3500_v37 = vmul.u32.u64.high %v3283_v20, %v1046_v22, %v3499_v17 }
  0xdd   : > { %v617_v56 = vshll.u32 %v4476_v49, %v3412_v28  ;;  %v4477_v5 = vmov 920167782   ;;  %v3510_v53 = vmul.u32.u64.low %v3283_v20, %v1050_v45  ;;  %v3511_v50 = vmul.u32.u64.high %v3283_v20, %v1050_v45, %v3510_v53 }
  0xde   : > { %v3507_v51 = vshll.u32 %v4477_v5, %v3412_v28  ;;  %vm2588_vm7 = vcmp.lt.s32.totalorder %v2587_v23, 0  ;;  %v618_v61 = vshrl.u32 %v4477_v5, %v3484_v47  ;;  %v1042_v22 = vsel %vm1036_vm5, %v1039_v40, %v1041_v52 }
  0xdf   : > { %v4478_v16 = vmov 2475754826   ;;  %v765_v21 = vsel %vm2588_vm7, 0, %v2587_v23  ;;  %v1123_v41 = vshll.u32 %v4475_v6, %v3295_v30  ;;  %v4479_v31 = vmov 2131351028  }
  0xe0   : > { %v1124_v26 = vshrl.u32 %v4478_v16, %v3323_v48  ;;  %v1126_v45 = vshll.u32 %v4478_v16, %v3295_v30  ;;  %v1127_v62 = vshrl.u32 %v4479_v31, %v3323_v48  ;;  %v770_v11 = vsub.s32 4294967266, %v765_v21 }
  0xe1   : > { %v4480_v10 = vmov 1326507024   ;;  %v1061_v39 = vadd.s32 1, %v3500_v37  ;;  %v4481_v40 = vand.u32 2147483647, %v3243_v34  ;;  %v1058_v23 = vmul.u32 %v3283_v20, %v1042_v22 }
  0xe2   : > { %v621_v27 = vshrl.u32 %v4480_v10, %v3484_v47  ;;  %vm1060_vm8 = vc.u32 %v3511_v50, %v3499_v17  ;;  %v1125_v53 = vor.u32 %v1124_v26, %v1123_v41  ;;  %v1128_v42 = vor.u32 %v1127_v62, %v1126_v45 }
  0xe3   : > { %v1113_v52 = vand.u32 8388607, %v4481_v40  ;;  %v750_v59 = vadd.s32 %v3351_v14, %v3348_v13  ;;  %v766_v43 = vsub.s32 32, %v765_v21  ;;  %v771_v60 = vadd.s32 127, %v770_v11 }
  0xe4   : > { %v1062_v10 = vsel %vm1060_vm8, %v1061_v39, %v3500_v37  ;;  %v3542_v0 = vor.u32 %v618_v61, %v617_v56  ;;  %v1129_v40 = vshll.u32 %v4479_v31, %v3295_v30  ;;  %v1130_v20 = vshrl.u32 %v4476_v49, %v3323_v48 }
  0xe5   : > { %v1063_v33 = vadd.s32 %v1062_v10, %v1058_v23  ;;  %v622_v22 = vor.u32 %v621_v27, %v3507_v51  ;;  %v1114_v26 = vor.u32 8388608, %v1113_v52  ;;  %vm1138_vm9 = vcmp.lt.s32.totalorder %v3365_v29, 1 }
  0xe6   : > { %vm1140_vm10 = vcmp.lt.s32.totalorder %v3365_v29, 3  ;;  %v1131_v14 = vor.u32 %v1130_v20, %v1129_v40  ;;  %v1146_v30 = vsel %vm1138_vm9, %v1125_v53, %v1128_v42  ;;  %v768_v37 = vshrl.u32 %v750_v59, %v766_v43 }
  0xe7   : > { %v1064_v13 = vadd.s32 536870912, %v1063_v33  ;;  %v1152_v56 = vsel %vm1140_vm10, %v3393_v18, %v3479_v7  ;;  %v772_v51 = vshll.u32 %v771_v60, 23  ;;  %v1122_v61 = vshrl.u32 %v4475_v6, %v3323_v48  ;;  %v512_v7 = vld [vmem:[%s3554_s16] sm:$0xff] }
  0xe8   : > { %vm1139_vm12 = vcmp.lt.s32.totalorder %v3365_v29, 2  ;;  %v1143_v45 = vsel %vm1141_vm15, %v1131_v14, 2102212464  ;;  %v1148_v62 = vsel %vm1140_vm10, %v1131_v14, %v3472_v3  ;;  %v1150_v11 = vsel %vm1138_vm9, %v1128_v42, %v1131_v14 }
  0xe9   : > { %v3565_v41 = vshrl.u32 %v1064_v13, 30  ;;  %v767_v60 = vshll.u32 %v3457_v4, %v765_v21  ;;  %v1149_v43 = vsel %vm1139_vm12, %v1146_v30, %v1148_v62  ;;  %v1153_v48 = vsel %vm1139_vm12, %v1150_v11, %v1152_v56 }
  0xea   : > { %v1154_v18 = vshll.u32 %v1114_v26, 8  ;;  %v1142_v27 = vsel %vm1138_vm9, %v1122_v61, %v1125_v53  ;;  %v1144_v3 = vsel %vm1140_vm10, %v1128_v42, %v1143_v45  ;;  %vm1424_vm13 = vcmask 130048  }
  0xeb   : > { %v1066_v59 = vshll.u32 %v3565_v41, 30  ;;  %v3585_v39 = vor.u32 %v768_v37, %v767_v60  ;;  %v3587_v52 = vor.u32 4788187, %v772_v51  ;;  %2698 = vmatmul.mubr.msk.f32.vlgmr.msra.gmra.mrb[0].mxu0 %vm1424_vm13, %v512_v7  ;;  %vm626_vm14 = vcmp.lt.s32.totalorder %v3481_v19, 4 }
  0xec   : > { %v3589_v4 = vmul.u32.u64.low %v1154_v18, %v1153_v48  ;;  %v3590_v21 = vmul.u32.u64.high %v1154_v18, %v1153_v48, %v3589_v4  ;;  %v3596_v10 = vmul.u32.u64.low %v1154_v18, %v1149_v43  ;;  %v3597_v40 = vmul.u32.u64.high %v1154_v18, %v1149_v43, %v3596_v10  ;;  %2701 = vmatpush3.msra.mxu0 %v3194_v9 }
  0xed   : > { %v3594_v23 = vsub.s32 %v1063_v33, %v1066_v59  ;;  %v3604_v42 = vsel %vm626_vm14, %v3542_v0, 920167782  ;;  %v3608_v53 = vsel %vm626_vm14, %v622_v22, 1326507024  ;;  %v3611_v20 = vshrl.u32 %v3396_v55, 5 }
  0xee   : > { %v1145_v33 = vsel %vm1139_vm12, %v1142_v27, %v1144_v3  ;;  %v3617_v26 = vshll.u32 %v4476_v49, %v3415_v35  ;;  %v927_v9 = vshrl.u32 %v4477_v5, %v3429_v8  ;;  %v4483_v14 = vand.u32 2147483647, %v3230_v24 }
  0xef   : > { %v1069_v13 = vsub.s32 0, %v3594_v23  ;;  %v774_v22 = vand.u32 2147483647, %v3587_v52  ;;  %v776_v55 = vcvt.s32.f32 %v3585_v39  ;;  %v1059_v29 = vadd.s32 %v3499_v17, %v3511_v50 }
  0xf0   : > { %v1216_v30 = vand.u32 8388607, %v4483_v14  ;;  %v1226_v56 = vshll.u32 %v4475_v6, %v3256_v58  ;;  %v1161_v51 = vmul.u32 %v1154_v18, %v1145_v33  ;;  %vm1163_vm15 = vc.u32 %v3590_v21, %v3596_v10 }
  0xf1   : > { %v2598_v37 = vmin.u32 %v1069_v13, %v3594_v23  ;;  %v1225_v61 = vshrl.u32 %v4475_v6, %v3268_v2  ;;  %v1164_v45 = vadd.s32 1, %v3597_v40  ;;  %v1227_v62 = vshrl.u32 %v4478_v16, %v3268_v2 }
  0xf2   : > { %v1229_v17 = vshll.u32 %v4478_v16, %v3256_v58  ;;  %v1230_v50 = vshrl.u32 %v4479_v31, %v3268_v2  ;;  %v1217_v7 = vor.u32 8388608, %v1216_v30  ;;  %v1232_v60 = vshll.u32 %v4479_v31, %v3256_v58 }
  0xf3   : > { %v1071_v11 = vclz %v2598_v37  ;;  %v1233_v43 = vshrl.u32 %v4476_v49, %v3268_v2  ;;  %vm1005_vm1 = vcmp.lt.s32.totalorder %v3233_v25, 0  ;;  %v1165_v48 = vsel %vm1163_vm15, %v1164_v45, %v3597_v40 }
  0xf4   : > { %v1228_v18 = vor.u32 %v1227_v62, %v1226_v56  ;;  %v1231_v59 = vor.u32 %v1230_v50, %v1229_v17  ;;  %vm1241_vm2 = vcmp.lt.s32.totalorder %v3298_v32, 1  ;;  %v1166_v3 = vadd.s32 %v1165_v48, %v1161_v51 }
  0xf5   : > { %v2599_v27 = vadd.s32 4294967294, %v1071_v11  ;;  %v1234_v39 = vor.u32 %v1233_v43, %v1232_v60  ;;  %vm1243_vm3 = vcmp.lt.s32.totalorder %v3298_v32, 3  ;;  %v1089_v52 = vsub.s32 4, %v3565_v41 }
  0xf6   : > { %vm1242_vm4 = vcmp.lt.s32.totalorder %v3298_v32, 2  ;;  %v1249_v58 = vsel %vm1241_vm2, %v1228_v18, %v1231_v59  ;;  %v1255_v2 = vsel %vm1243_vm3, %v3320_v46, %v3386_v54  ;;  %v4484_v4 = vand.u32 2147483647, %v3233_v25 }
  0xf7   : > { %vm2600_vm7 = vcmp.lt.s32.totalorder %v2599_v27, 0  ;;  %v1167_v33 = vadd.s32 536870912, %v1166_v3  ;;  %v1246_v13 = vsel %vm1244_vm6, %v1234_v39, 2102212464  ;;  %v1251_v14 = vsel %vm1243_vm3, %v1234_v39, %v3371_v36 }
  0xf8   : > { %vm3660_vm5 = vcmp.le.f32.partialorder %v4484_v4, 0.7853982  ;;  %v1074_v30 = vsel %vm2600_vm7, 0, %v2599_v27  ;;  %v1252_v56 = vsel %vm1242_vm4, %v1249_v58, %v1251_v14  ;;  %v1253_v46 = vsel %vm1241_vm2, %v1231_v59, %v1234_v39 }
  0xf9   : > { %v1257_v54 = vshll.u32 %v1217_v7, 8  ;;  %v1075_v37 = vsub.s32 32, %v1074_v30  ;;  %v1079_v51 = vsub.s32 4294967266, %v1074_v30  ;;  %v3673_v45 = vshrl.u32 %v1167_v33, 30 }
  0xfa   : > { %v1245_v62 = vsel %vm1241_vm2, %v1225_v61, %v1228_v18  ;;  %v1247_v17 = vsel %vm1243_vm3, %v1231_v59, %v1246_v13  ;;  %v1256_v36 = vsel %vm1242_vm4, %v1253_v46, %v1255_v2  ;;  %vm696_vm6 = vcmp.lt.s32.totalorder %v3249_v44, 0 }
  0xfb   : > { %v3681_v50 = vmul.u32.u64.low %v1257_v54, %v1252_v56  ;;  %v3682_v11 = vmul.u32.u64.high %v1257_v54, %v1252_v56, %v3681_v50  ;;  %v1076_v7 = vshll.u32 %v3594_v23, %v1074_v30  ;;  %v1077_v60 = vshrl.u32 %v1059_v29, %v1075_v37 }
  0xfc   : > { %v1080_v43 = vadd.s32 127, %v1079_v51  ;;  %v1169_v48 = vshll.u32 %v3673_v45, 30  ;;  %v777_v27 = vmul.f32 %v776_v55, %v774_v22  ;;  %v824_v61 = vshrl.u32 %v4477_v5, %v3439_v57 }
  0xfd   : > { %v3690_v18 = vmul.u32.u64.low %v1257_v54, %v1256_v36  ;;  %v3691_v59 = vmul.u32.u64.high %v1257_v54, %v1256_v36, %v3690_v18  ;;  %v1078_v39 = vor.u32 %v1077_v60, %v1076_v7  ;;  %v1090_v2 = vsel %vm1005_vm1, %v1089_v52, %v3565_v41 }
  0xfe   : > { %v1081_v58 = vshll.u32 %v1080_v43, 23  ;;  %v3696_v4 = vsub.s32 %v1166_v3, %v1169_v48  ;;  %v3699_v23 = vor.u32 %v927_v9, %v3617_v26  ;;  %v823_v22 = vshll.u32 %v4476_v49, %v3422_v38 }
  0xff   : > { %v1248_v5 = vsel %vm1242_vm4, %v1245_v62, %v1247_v17  ;;  %v1267_v55 = vadd.s32 1, %v3682_v11  ;;  %vm935_vm8 = vcmp.lt.s32.totalorder %v3611_v20, 4  ;;  %v3708_v29 = vshrl.u32 %v3417_v12, 5 }
 0x100   : > { %v1082_v33 = vor.u32 4788187, %v1081_v58  ;;  %v1172_v41 = vsub.s32 0, %v3696_v4  ;;  %v778_v3 = vxor.u32 2147483648, %v777_v27  ;;  %v3711_v52 = vor.u32 %v824_v61, %v823_v22  ;;  %v1500_v22 = vld [vmem:[%s4405_s6 + $0x10] sm:$0xff] }
 0x101   : > { %v1092_v26 = vsel %vm3660_vm5, 0, %v1090_v2  ;;  %vm1266_vm9 = vc.u32 %v3691_v59, %v3681_v50  ;;  %v1085_v9 = vcvt.s32.f32 %v1078_v39  ;;  %v1264_v14 = vmul.u32 %v1257_v54, %v1248_v5 }
 0x102   : > { %v1083_v32 = vand.u32 2147483647, %v1082_v33  ;;  %v2602_v13 = vmin.u32 %v1172_v41, %v3696_v4  ;;  %v3721_v12 = vsel %vm935_vm8, %v3699_v23, 920167782  ;;  %v4487_v30 = vor.u32 %v3449_v15, %v3445_v63 }
 0x103   : > { %v1268_v46 = vsel %vm1266_vm9, %v1267_v55, %v3682_v11  ;;  %v591_v37 = vand.u32 2147483647, %v3265_v1  ;;  %v3732_v62 = vand.u32 3, %v1092_v26  ;;  %vm1108_vm10 = vcmp.lt.s32.totalorder %v3243_v34, 0 }
 0x104   : > { %v3728_v56 = vsel %vm935_vm8, %v4487_v30, 1326507024  ;;  %v1086_v51 = vmul.f32 %v1085_v9, %v1083_v32  ;;  %v1174_v54 = vclz %v2602_v13  ;;  %v1269_v17 = vadd.s32 %v1268_v46, %v1264_v14 }
 0x105   : > { %v3737_v36 = vsel %vm696_vm6, %v778_v3, %v777_v27  ;;  %v608_v63 = vshll.u32 %v4475_v6, %v3412_v28  ;;  %v609_v15 = vshrl.u32 %v4478_v16, %v3484_v47  ;;  %v612_v11 = vshrl.u32 %v4479_v31, %v3484_v47 }
 0x106   : > { %v1087_v7 = vxor.u32 2147483648, %v1086_v51  ;;  %v2603_v60 = vadd.s32 4294967294, %v1174_v54  ;;  %v1270_v43 = vadd.s32 536870912, %v1269_v17  ;;  %v615_v48 = vshrl.u32 %v4476_v49, %v3484_v47 }
 0x107   : > { %v1192_v61 = vsub.s32 4, %v3673_v45  ;;  %v598_v27 = vand.u32 8388607, %v591_v37  ;;  %v611_v18 = vshll.u32 %v4478_v16, %v3412_v28  ;;  %v614_v39 = vshll.u32 %v4479_v31, %v3412_v28 }
 0x108   : > { %v1088_v58 = vsel %vm1005_vm1, %v1087_v7, %v1086_v51  ;;  %v4488_v2 = vand.u32 2147483647, %v3243_v34  ;;  %vm2604_vm15 = vcmp.lt.s32.totalorder %v2603_v60, 0  ;;  %v3762_v5 = vshrl.u32 %v1270_v43, 30 }
 0x109   : > { %v610_v55 = vor.u32 %v609_v15, %v608_v63  ;;  %v1091_v33 = vsel %vm3660_vm5, %v3233_v25, %v1088_v58  ;;  %v1177_v41 = vsel %vm2604_vm15, 0, %v2603_v60  ;;  %v613_v3 = vor.u32 %v612_v11, %v611_v18 }
 0x10a   : > { %vm3758_vm12 = vcmp.le.f32.partialorder %v4488_v2, 0.7853982  ;;  %v616_v28 = vor.u32 %v615_v48, %v614_v39  ;;  %2896 = vcosq.f32 %v1091_v33  ;;  %v1162_v26 = vadd.s32 %v3596_v10, %v3590_v21 }
 0x10b   : > { %v1178_v32 = vsub.s32 32, %v1177_v41  ;;  %v1182_v9 = vsub.s32 4294967266, %v1177_v41  ;;  %2898 = vsinq.f32 %v1091_v33  ;;  %v1272_v13 = vshll.u32 %v3762_v5, 30 }
 0x10c   : > { %v599_v14 = vor.u32 8388608, %v598_v27  ;;  %vm623_vm1 = vcmp.lt.s32.totalorder %v3481_v19, 1  ;;  %v1179_v30 = vshll.u32 %v3696_v4, %v1177_v41  ;;  %vm625_vm2 = vcmp.lt.s32.totalorder %v3481_v19, 3 }
 0x10d   : > { %v1180_v46 = vshrl.u32 %v1162_v26, %v1178_v32  ;;  %v1183_v40 = vadd.s32 127, %v1182_v9  ;;  %v1193_v51 = vsel %vm1108_vm10, %v1192_v61, %v3673_v45  ;;  %v3776_v54 = vsub.s32 %v1269_v17, %v1272_v13 }
 0x10e   : > { %v631_v21 = vsel %vm623_vm1, %v610_v55, %v613_v3  ;;  %v633_v10 = vsel %vm625_vm2, %v616_v28, %v3604_v42  ;;  %v607_v4 = vshrl.u32 %v4475_v6, %v3484_v47  ;;  %v628_v11 = vsel %vm626_vm14, %v616_v28, 2102212464 }
 0x10f   : > { %v1181_v63 = vor.u32 %v1180_v46, %v1179_v30  ;;  %v1184_v15 = vshll.u32 %v1183_v40, 23  ;;  %v1275_v7 = vsub.s32 0, %v3776_v54  ;;  %vm624_vm3 = vcmp.lt.s32.totalorder %v3481_v19, 2 }
 0x110   : > { %v635_v45 = vsel %vm623_vm1, %v613_v3, %v616_v28  ;;  %v637_v42 = vsel %vm625_vm2, %v3542_v0, %v3608_v53  ;;  %vm1503_vm4 = vcmask 64512   ;;  %v634_v47 = vsel %vm624_vm3, %v631_v21, %v633_v10 }
 0x111   : > { %v1185_v17 = vor.u32 4788187, %v1184_v15  ;;  %v638_v60 = vsel %vm624_vm3, %v635_v45, %v637_v42  ;;  %v639_v43 = vshll.u32 %v599_v14, 8  ;;  %vm1095_vm14 = vweird.f32 %v3233_v25  ;;  %v4492_v45 = vld [vmem:[#allocation10_spill] sm:$0xff] }
 0x112   : > { %v1195_v48 = vsel %vm3758_vm12, 0, %v1193_v51  ;;  %v2606_v61 = vmin.u32 %v1275_v7, %v3776_v54  ;;  %v627_v27 = vsel %vm623_vm1, %v607_v4, %v610_v55  ;;  %v629_v0 = vsel %vm625_vm2, %v613_v3, %v628_v11  ;;  %v4491_v51 = vld [vmem:[#allocation8_spill] sm:$0xff] }
 0x113   : > { %v1186_v53 = vand.u32 2147483647, %v1185_v17  ;;  %v1188_v18 = vcvt.s32.f32 %v1181_v63  ;;  %v3807_v39 = vmul.u32.u64.low %v639_v43, %v638_v60  ;;  %v3808_v58 = vmul.u32.u64.high %v639_v43, %v638_v60, %v3807_v39 }
 0x114   : > { %vm1097_vm5 = vcmp.lt.s32.totalorder %v3732_v62, 2  ;;  %v1277_v2 = vclz %v2606_v61  ;;  %v3811_v33 = vmul.u32.u64.low %v639_v43, %v634_v47  ;;  %v3812_v41 = vmul.u32.u64.high %v639_v43, %v634_v47, %v3811_v33  ;;  %v2897_v28 = vpop.eup %2896 }
 0x115   : > { %vm1098_vm7 = vcmp.eq.s32.totalorder %v3732_v62, 0  ;;  %vm1101_vm9 = vcmp.eq.s32.totalorder %v3732_v62, 2  ;;  %v1189_v55 = vmul.f32 %v1188_v18, %v1186_v53  ;;  %v3817_v26 = vand.u32 3, %v1195_v48  ;;  %v2899_v3 = vpop.eup %2898  ;;  %v4496_v18 = vld [vmem:[#allocation9_spill] sm:$0xff] }
 0x116   : > { %v1102_v32 = vxor.u32 2147483648, %v2897_v28  ;;  %v1265_v9 = vadd.s32 %v3681_v50, %v3691_v59  ;;  %v2607_v13 = vadd.s32 4294967294, %v1277_v2  ;;  %v630_v14 = vsel %vm624_vm3, %v627_v27, %v629_v0 }
 0x117   : > { %v1099_v30 = vxor.u32 2147483648, %v2899_v3  ;;  %v1190_v46 = vxor.u32 2147483648, %v1189_v55  ;;  %vm1211_vm15 = vcmp.lt.s32.totalorder %v3230_v24, 0  ;;  %v1295_v40 = vsub.s32 4, %v3762_v5 }
 0x118   : > { %v1312_v21 = vand.u32 2147483647, %v4491_v51  ;;  %v1103_v10 = vsel %vm1101_vm9, %v1102_v32, %v2899_v3  ;;  %vm2608_vm1 = vcmp.lt.s32.totalorder %v2607_v13, 0  ;;  %vm648_vm2 = vc.u32 %v3808_v58, %v3811_v33 }
 0x119   : > { %v649_v63 = vadd.s32 1, %v3812_v41  ;;  %v1100_v50 = vsel %vm1098_vm7, %v2897_v28, %v1099_v30  ;;  %v1191_v19 = vsel %vm1108_vm10, %v1190_v46, %v1189_v55  ;;  %v1280_v59 = vsel %vm2608_vm1, 0, %v2607_v13 }
 0x11a   : > { %v646_v15 = vmul.u32 %v639_v43, %v630_v14  ;;  %v1104_v4 = vsel %vm1097_vm5, %v1100_v50, %v1103_v10  ;;  %v1194_v11 = vsel %vm3758_vm12, %v3243_v34, %v1191_v19  ;;  %v1281_v7 = vsub.s32 32, %v1280_v59  ;;  %v1501_v43 = vld [vmem:[%s4405_s6 + $0x18] sm:$0xff]  ;;  %v4497_v10 = vld [vmem:[#allocation11_spill] sm:$0xff] }
 0x11b   : > { %v1330_v42 = vshrl.u32 %v4478_v16, %v4492_v45  ;;  %v1105_v17 = vsel %vm1095_vm14, nan, %v1104_v4  ;;  %2900 = vcosq.f32 %v1194_v11  ;;  %v4493_v47 = vand.u32 2147483647, %v3230_v24 }
 0x11c   : > { %v1285_v62 = vsub.s32 4294967266, %v1280_v59  ;;  %v650_v25 = vsel %vm648_vm2, %v649_v63, %v3812_v41  ;;  %2708 = vmatprep.mubr.msk.f32.mxu1 %vm1503_vm4, %v1105_v17  ;;  %2902 = vsinq.f32 %v1194_v11  ;;  %v1283_v48 = vshrl.u32 %v1265_v9, %v1281_v7 }
 0x11d   : > { %vm3844_vm10 = vcmp.le.f32.partialorder %v4493_v47, 0.7853982  ;;  %v651_v61 = vadd.s32 %v650_v25, %v646_v15  ;;  %v1319_v27 = vand.u32 8388607, %v1312_v21  ;;  %v1282_v0 = vshll.u32 %v3776_v54, %v1280_v59  ;;  %v4498_v59 = vld [vmem:[#allocation16_spill] sm:$0xff]  ;;  %v4499_v15 = vld [vmem:[#allocation14_spill] sm:$0xff] }
 0x11e   : > { %v1286_v53 = vadd.s32 127, %v1285_v62  ;;  %v1332_v39 = vshll.u32 %v4478_v16, %v4496_v18  ;;  %v1333_v2 = vshrl.u32 %v4479_v31, %v4492_v45  ;;  %v3866_v28 = vpack.c.bf16 %v1501_v43, %v1500_v22 }
 0x11f   : > { %v652_v41 = vadd.s32 536870912, %v651_v61  ;;  %v1335_v55 = vshll.u32 %v4479_v31, %v4496_v18  ;;  %v1336_v3 = vshrl.u32 %v4476_v49, %v4492_v45  ;;  %v1284_v32 = vor.u32 %v1283_v48, %v1282_v0  ;;  %v4500_v48 = vld [vmem:[#allocation15_spill] sm:$0xff] }
 0x120   : > { %v1287_v9 = vshll.u32 %v1286_v53, 23  ;;  %v1329_v54 = vshll.u32 %v4475_v6, %v4496_v18  ;;  %v1334_v13 = vor.u32 %v1333_v2, %v1332_v39  ;;  %v3877_v14 = vsel %vm1211_vm15, %v1295_v40, %v3762_v5 }
 0x121   : > { %v3879_v30 = vshrl.u32 %v652_v41, 30  ;;  %v1337_v46 = vor.u32 %v1336_v3, %v1335_v55  ;;  %vm1346_vm12 = vcmp.lt.s32.totalorder %v4497_v10, 3  ;;  %vm1200_vm3 = vcmp.lt.s32.totalorder %v3817_v26, 2 }
 0x122   : > { %v1288_v63 = vor.u32 4788187, %v1287_v9  ;;  %v1320_v50 = vor.u32 8388608, %v1319_v27  ;;  %v1331_v19 = vor.u32 %v1330_v42, %v1329_v54  ;;  %v1358_v4 = vsel %vm1346_vm12, %v4499_v15, %v4498_v59 }
 0x123   : > { %vm1198_vm14 = vweird.f32 %v3243_v34  ;;  %vm1201_vm5 = vcmp.eq.s32.totalorder %v3817_v26, 0  ;;  %vm1204_vm7 = vcmp.eq.s32.totalorder %v3817_v26, 2  ;;  %v654_v5 = vshll.u32 %v3879_v30, 30 }
 0x124   : > { %vm1344_vm9 = vcmp.lt.s32.totalorder %v4497_v10, 1  ;;  %v1289_v40 = vand.u32 2147483647, %v1288_v63  ;;  %v1291_v11 = vcvt.s32.f32 %v1284_v32  ;;  %vm1345_vm1 = vcmp.lt.s32.totalorder %v4497_v10, 2 }
 0x125   : > { %v1356_v7 = vsel %vm1344_vm9, %v1334_v13, %v1337_v46  ;;  %v1298_v42 = vsel %vm3844_vm10, 0, %v3877_v14  ;;  %v3898_v17 = vsub.s32 %v651_v61, %v654_v5  ;;  %v1328_v47 = vshrl.u32 %v4475_v6, %v4492_v45  ;;  %v2901_v22 = vpop.eup %2900 }
 0x126   : > { %v1359_v62 = vsel %vm1345_vm1, %v1356_v7, %v1358_v4  ;;  %v1292_v43 = vmul.f32 %v1291_v11, %v1289_v40  ;;  %v1352_v25 = vsel %vm1344_vm9, %v1331_v19, %v1334_v13  ;;  %v1354_v27 = vsel %vm1346_vm12, %v1337_v46, %v4500_v48  ;;  %v2903_v53 = vpop.eup %2902  ;;  %v4504_v40 = vld [vmem:[#allocation17_spill] sm:$0xff] }
 0x127   : > { %v1360_v0 = vshll.u32 %v1320_v50, 8  ;;  %v1205_v18 = vxor.u32 2147483648, %v2901_v22  ;;  %v657_v61 = vsub.s32 0, %v3898_v17  ;;  %v1348_v45 = vsel %vm1344_vm9, %v1328_v47, %v1331_v19 }
 0x128   : > { %v1349_v39 = vsel %vm1347_vm11, %v1337_v46, 2102212464  ;;  %v1202_v2 = vxor.u32 2147483648, %v2903_v53  ;;  %v1293_v41 = vxor.u32 2147483648, %v1292_v43  ;;  %v677_v54 = vsub.s32 4, %v3879_v30 }
 0x129   : > { %v3914_v55 = vmul.u32.u64.low %v1360_v0, %v1359_v62  ;;  %v3915_v3 = vmul.u32.u64.high %v1360_v0, %v1359_v62, %v3914_v55  ;;  %v1206_v32 = vsel %vm1204_vm7, %v1205_v18, %v2903_v53  ;;  %v2582_v9 = vmin.u32 %v657_v61, %v3898_v17 }
 0x12a   : > { %v1355_v14 = vsel %vm1345_vm1, %v1352_v25, %v1354_v27  ;;  %v1203_v63 = vsel %vm1201_vm5, %v2901_v22, %v1202_v2  ;;  %v1294_v46 = vsel %vm1211_vm15, %v1293_v41, %v1292_v43  ;;  %v1350_v50 = vsel %vm1346_vm12, %v1334_v13, %v1349_v39  ;;  %v4505_v22 = vld [vmem:[#allocation7_spill] sm:$0xff]  ;;  %v4508_v2 = vld [vmem:[#allocation13_spill] sm:$0xff] }
 0x12b   : > { %v4501_v19 = vand.u32 2147483647, %v3249_v44  ;;  %v1207_v15 = vsel %vm1200_vm3, %v1203_v63, %v1206_v32  ;;  %v1297_v4 = vsel %vm3844_vm10, %v3230_v24, %v1294_v46  ;;  %v659_v5 = vclz %v2582_v9 }
 0x12c   : > { %v780_v11 = vsub.s32 4, %v4504_v40  ;;  %v1208_v7 = vsel %vm1198_vm14, nan, %v1207_v15  ;;  %2904 = vcosq.f32 %v1297_v4  ;;  %v1351_v34 = vsel %vm1345_vm1, %v1348_v45, %v1350_v50 }
 0x12d   : > { %vm3931_vm11 = vcmp.le.f32.partialorder %v4501_v19, 0.7853982  ;;  %v3943_v13 = vmul.u32.u64.low %v1360_v0, %v1355_v14  ;;  %v3944_v47 = vmul.u32.u64.high %v1360_v0, %v1355_v14, %v3943_v13  ;;  %2709 = vmatmul.mubr.msk.f32.vlgmr.msra.gmra.mrb[0].mxu1 %vm1503_vm4, %v1208_v7  ;;  %2906 = vsinq.f32 %v1297_v4 }
 0x12e   : > { %v2583_v62 = vadd.s32 4294967294, %v659_v5  ;;  %v781_v26 = vsel %vm696_vm6, %v780_v11, %v4504_v40  ;;  %v782_v60 = vsel %vm3931_vm11, %v3249_v44, %v3737_v36  ;;  %2778 = vmatpush3.bf16.msra.mxu1 %v4505_v22  ;;  %vm593_vm6 = vcmp.lt.s32.totalorder %v3265_v1, 0 }
 0x12f   : > { %v3958_v43 = vadd.s32 %v3943_v13, %v3915_v3  ;;  %vm1369_vm15 = vc.u32 %v3915_v3, %v3943_v13  ;;  %2908 = vcosq.f32 %v782_v60  ;;  %2780 = vmatprep.subr.bf16.mxu1 %v3866_v28  ;;  %v783_v25 = vsel %vm3931_vm11, 0, %v781_v26 }
 0x130   : > { %vm2584_vm2 = vcmp.lt.s32.totalorder %v2583_v62, 0  ;;  %2910 = vsinq.f32 %v782_v60  ;;  %v1302_v36 = vand.u32 3, %v1298_v42  ;;  %vm3967_vm10 = vcmp.le.f32.partialorder %v591_v37, 0.7853982 }
 0x131   : > { %v662_v48 = vsel %vm2584_vm2, 0, %v2583_v62  ;;  %v1370_v27 = vadd.s32 1, %v3944_v47  ;;  %v647_v53 = vadd.s32 %v3811_v33, %v3808_v58  ;;  %v1367_v45 = vmul.u32 %v1360_v0, %v1351_v34 }
 0x132   : > { %v663_v18 = vsub.s32 32, %v662_v48  ;;  %v667_v61 = vsub.s32 4294967266, %v662_v48  ;;  %v678_v39 = vsel %vm593_vm6, %v677_v54, %v3879_v30  ;;  %2782 = vmatpush3.bf16.msra.mxu1 %v3866_v28  ;;  %v787_v42 = vand.u32 3, %v783_v25 }
 0x133   : > { %v1371_v37 = vsel %vm1369_vm15, %v1370_v27, %v3944_v47  ;;  %v797_v41 = vand.u32 2147483647, %v4508_v2  ;;  %vm1301_vm12 = vweird.f32 %v3230_v24  ;;  %v664_v58 = vshll.u32 %v3898_v17, %v662_v48 }
 0x134   : > { %v665_v33 = vshrl.u32 %v647_v53, %v663_v18  ;;  %v668_v55 = vadd.s32 127, %v667_v61  ;;  %v1372_v0 = vadd.s32 %v1371_v37, %v1367_v45  ;;  %v4509_v32 = vmov 0.0|0.0  }
 0x135   : > { %2794 = vmatprep.subr.bf16.mxu1 %v4509_v32  ;;  %vm832_vm3 = vcmp.lt.s32.totalorder %v3708_v29, 4  ;;  %vm1303_vm14 = vcmp.lt.s32.totalorder %v1302_v36, 2  ;;  %vm1304_vm5 = vcmp.eq.s32.totalorder %v1302_v36, 0  ;;  %vm1307_vm7 = vcmp.eq.s32.totalorder %v1302_v36, 2 }
 0x136   : > { %v815_v28 = vshrl.u32 %v4478_v16, %v3439_v57  ;;  %v666_v30 = vor.u32 %v665_v33, %v664_v58  ;;  %v669_v3 = vshll.u32 %v668_v55, 23  ;;  %v680_v9 = vsel %vm3967_vm10, 0, %v678_v39  ;;  %v2905_v17 = vpop.eup %2904  ;;  %v4510_v55 = vld [vmem:[#allocation19_spill] sm:$0xff] }
 0x137   : > { %v1373_v54 = vadd.s32 536870912, %v1372_v0  ;;  %vm789_vm9 = vcmp.eq.s32.totalorder %v787_v42, 0  ;;  %vm792_vm1 = vcmp.eq.s32.totalorder %v787_v42, 2  ;;  %v804_v14 = vand.u32 8388607, %v797_v41  ;;  %v2907_v46 = vpop.eup %2906 }
 0x138   : > { %v814_v63 = vshll.u32 %v4475_v6, %v3422_v38  ;;  %v1308_v50 = vxor.u32 2147483648, %v2905_v17  ;;  %v670_v19 = vor.u32 4788187, %v669_v3  ;;  %v818_v15 = vshrl.u32 %v4479_v31, %v3439_v57 }
 0x139   : > { %v3994_v59 = vshrl.u32 %v1373_v54, 30  ;;  %v2909_v4 = vpop.eup %2908  ;;  %v1305_v5 = vxor.u32 2147483648, %v2907_v46  ;;  %v817_v11 = vshll.u32 %v4478_v16, %v3422_v38  ;;  %v821_v7 = vshrl.u32 %v4476_v49, %v3439_v57 }
 0x13a   : > { %v816_v40 = vor.u32 %v815_v28, %v814_v63  ;;  %v2911_v13 = vpop.eup %2910  ;;  %v1309_v47 = vsel %vm1307_vm7, %v1308_v50, %v2907_v46  ;;  %v671_v62 = vand.u32 2147483647, %v670_v19  ;;  %v673_v26 = vcvt.s32.f32 %v666_v30 }
 0x13b   : > { %v1375_v60 = vshll.u32 %v3994_v59, 30  ;;  %v1306_v22 = vsel %vm1304_vm5, %v2905_v17, %v1305_v5  ;;  %v790_v34 = vxor.u32 2147483648, %v2911_v13  ;;  %v793_v25 = vxor.u32 2147483648, %v2909_v4 }
 0x13c   : > { %v820_v48 = vshll.u32 %v4479_v31, %v3422_v38  ;;  %v1310_v27 = vsel %vm1303_vm14, %v1306_v22, %v1309_v47  ;;  %v674_v53 = vmul.f32 %v673_v26, %v671_v62  ;;  %v819_v61 = vor.u32 %v818_v15, %v817_v11  ;;  %v4511_v38 = vld [vmem:[#allocation18_spill] sm:$0xff]  ;;  %v4513_v62 = vld [vmem:[#allocation12_spill] sm:$0xff] }
 0x13d   : > { %v4008_v18 = vsub.s32 %v1372_v0, %v1375_v60  ;;  %v1311_v45 = vsel %vm1301_vm12, nan, %v1310_v27  ;;  %v791_v39 = vsel %vm789_vm9, %v2909_v4, %v790_v34  ;;  %v794_v37 = vsel %vm792_vm1, %v793_v25, %v2911_v13 }
 0x13e   : > { %v822_v58 = vor.u32 %v821_v7, %v820_v48  ;;  %v838_v33 = vsel %vm832_vm3, %v3711_v52, 920167782  ;;  %v4512_v36 = vor.u32 %v4510_v55, %v4511_v38  ;;  %2711 = vmatprep.mubr.msk.f32.mxu1 %vm1503_vm4, %v1311_v45  ;;  %v675_v28 = vxor.u32 2147483648, %v674_v53 }
 0x13f   : > { %v1378_v24 = vsub.s32 0, %v4008_v18  ;;  %v4024_v30 = vand.u32 3, %v680_v9  ;;  %vm788_vm11 = vcmp.lt.s32.totalorder %v787_v42, 2  ;;  %v805_v3 = vor.u32 8388608, %v804_v14 }
 0x140   : > { %v842_v0 = vsel %vm832_vm3, %v4512_v36, 1326507024  ;;  %v813_v54 = vshrl.u32 %v4475_v6, %v3439_v57  ;;  %v676_v17 = vsel %vm593_vm6, %v675_v28, %v674_v53  ;;  %v795_v46 = vsel %vm788_vm11, %v791_v39, %v794_v37 }
 0x141   : > { %v2610_v63 = vmin.u32 %v1378_v24, %v4008_v18  ;;  %vm829_vm15 = vcmp.lt.s32.totalorder %v3708_v29, 1  ;;  %v679_v50 = vsel %vm3967_vm10, %v3265_v1, %v676_v17  ;;  %vm831_vm2 = vcmp.lt.s32.totalorder %v3708_v29, 3 }
 0x142   : > { %v834_v42 = vsel %vm832_vm3, %v822_v58, 2102212464  ;;  %v837_v9 = vsel %vm829_vm15, %v816_v40, %v819_v61  ;;  %2912 = vcosq.f32 %v679_v50  ;;  %vm830_vm12 = vcmp.lt.s32.totalorder %v3708_v29, 2 }
 0x143   : > { %v1380_v57 = vclz %v2610_v63  ;;  %v839_v14 = vsel %vm831_vm2, %v822_v58, %v838_v33  ;;  %2914 = vsinq.f32 %v679_v50  ;;  %v833_v19 = vsel %vm829_vm15, %v813_v54, %v816_v40 }
 0x144   : > { %v835_v15 = vsel %vm831_vm2, %v819_v61, %v834_v42  ;;  %v841_v4 = vsel %vm829_vm15, %v819_v61, %v822_v58  ;;  %v840_v10 = vsel %vm830_vm12, %v837_v9, %v839_v14  ;;  %v843_v11 = vsel %vm831_vm2, %v3711_v52, %v842_v0 }
 0x145   : > { %v2611_v5 = vadd.s32 4294967294, %v1380_v57  ;;  %v845_v7 = vshll.u32 %v805_v3, 8  ;;  %v1398_v13 = vsub.s32 4, %v3994_v59  ;;  %vm786_vm6 = vweird.f32 %v3249_v44 }
 0x146   : > { %v844_v47 = vsel %vm830_vm12, %v841_v4, %v843_v11  ;;  %v900_v26 = vand.u32 2147483647, %v4513_v62  ;;  %vm689_vm10 = vcmp.eq.s32.totalorder %v4024_v30, 2  ;;  %v4048_v40 = vsel %vm786_vm6, nan, %v795_v46 }
 0x147   : > { %vm2612_vm3 = vcmp.lt.s32.totalorder %v2611_v5, 0  ;;  %v4050_v60 = vmul.u32.u64.low %v845_v7, %v844_v47  ;;  %v4051_v22 = vmul.u32.u64.high %v845_v7, %v844_v47, %v4050_v60  ;;  %vm686_vm14 = vcmp.eq.s32.totalorder %v4024_v30, 0 }
 0x148   : > { %v1383_v52 = vsel %vm2612_vm3, 0, %v2611_v5  ;;  %v836_v34 = vsel %vm830_vm12, %v833_v19, %v835_v15  ;;  %v4056_v44 = vmul.u32.u64.low %v845_v7, %v840_v10  ;;  %v4057_v25 = vmul.u32.u64.high %v845_v7, %v840_v10, %v4056_v44 }
 0x149   : > { %vm685_vm5 = vcmp.lt.s32.totalorder %v4024_v30, 2  ;;  %v1384_v48 = vsub.s32 32, %v1383_v52  ;;  %v1385_v27 = vshll.u32 %v4008_v18, %v1383_v52  ;;  %v1388_v53 = vsub.s32 4294967266, %v1383_v52 }
 0x14a   : > { %v907_v61 = vand.u32 8388607, %v900_v26  ;;  %vm683_vm7 = vweird.f32 %v3265_v1  ;;  %v917_v45 = vshll.u32 %v4475_v6, %v3415_v35  ;;  %v918_v29 = vshrl.u32 %v4478_v16, %v3429_v8 }
 0x14b   : > { %v920_v39 = vshll.u32 %v4478_v16, %v3415_v35  ;;  %v921_v37 = vshrl.u32 %v4479_v31, %v3429_v8  ;;  %v1386_v18 = vshrl.u32 %v3958_v43, %v1384_v48  ;;  %v1389_v58 = vadd.s32 127, %v1388_v53 }
 0x14c   : > { %v4074_v33 = vadd.s32 %v4056_v44, %v4051_v22  ;;  %vm854_vm9 = vc.u32 %v4051_v22, %v4056_v44  ;;  %v852_v55 = vmul.u32 %v845_v7, %v836_v34  ;;  %v855_v38 = vadd.s32 1, %v4057_v25  ;;  %v2913_v28 = vpop.eup %2912 }
 0x14d   : > { %v916_v36 = vshrl.u32 %v4475_v6, %v3429_v8  ;;  %v919_v0 = vor.u32 %v918_v29, %v917_v45  ;;  %v1387_v16 = vor.u32 %v1386_v18, %v1385_v27  ;;  %v1390_v24 = vshll.u32 %v1389_v58, 23  ;;  %v2915_v54 = vpop.eup %2914 }
 0x14e   : > { %v922_v3 = vor.u32 %v921_v37, %v920_v39  ;;  %v924_v43 = vshrl.u32 %v4476_v49, %v3429_v8  ;;  %v690_v17 = vxor.u32 2147483648, %v2913_v28  ;;  %vm1314_vm1 = vcmp.lt.s32.totalorder %v4491_v51, 0 }
 0x14f   : > { %v856_v63 = vsel %vm854_vm9, %v855_v38, %v4057_v25  ;;  %v908_v46 = vor.u32 8388608, %v907_v61  ;;  %v923_v50 = vshll.u32 %v4479_v31, %v3415_v35  ;;  %v687_v42 = vxor.u32 2147483648, %v2915_v54 }
 0x150   : > { %v1391_v6 = vor.u32 4788187, %v1390_v24  ;;  %v857_v9 = vadd.s32 %v856_v63, %v852_v55  ;;  %vm932_vm11 = vcmp.lt.s32.totalorder %v3611_v20, 1  ;;  %v691_v57 = vsel %vm689_vm10, %v690_v17, %v2915_v54 }
 0x151   : > { %v1394_v14 = vcvt.s32.f32 %v1387_v16  ;;  %v925_v8 = vor.u32 %v924_v43, %v923_v50  ;;  %vm934_vm15 = vcmp.lt.s32.totalorder %v3611_v20, 3  ;;  %v688_v49 = vsel %vm686_vm14, %v2913_v28, %v687_v42 }
 0x152   : > { %v1392_v19 = vand.u32 2147483647, %v1391_v6  ;;  %v858_v15 = vadd.s32 536870912, %v857_v9  ;;  %v940_v35 = vsel %vm932_vm11, %v919_v0, %v922_v3  ;;  %v692_v31 = vsel %vm685_vm5, %v688_v49, %v691_v57 }
 0x153   : > { %v937_v4 = vsel %vm935_vm8, %v925_v8, 2102212464  ;;  %v942_v5 = vsel %vm934_vm15, %v925_v8, %v3721_v12  ;;  %v944_v10 = vsel %vm932_vm11, %v922_v3, %v925_v8  ;;  %v693_v11 = vsel %vm683_vm7, nan, %v692_v31 }
 0x154   : > { %v1395_v7 = vmul.f32 %v1394_v14, %v1392_v19  ;;  %v4105_v47 = vshrl.u32 %v858_v15, 30  ;;  %vm933_vm2 = vcmp.lt.s32.totalorder %v3611_v20, 2  ;;  %2702 = vmatprep.mubr.msk.f32.mxu0 %vm1503_vm4, %v693_v11  ;;  %v936_v30 = vsel %vm932_vm11, %v916_v36, %v919_v0 }
 0x155   : > { %v943_v60 = vsel %vm933_vm2, %v940_v35, %v942_v5  ;;  %v946_v12 = vsel %vm934_vm15, %v3699_v23, %v3728_v56  ;;  %v948_v1 = vshll.u32 %v908_v46, 8  ;;  %2703 = vmatmul.mubr.msk.f32.vlgmr.msra.gmra.mrb[2].mxu0 %vm1503_vm4, %v4048_v40  ;;  %v938_v34 = vsel %vm934_vm15, %v922_v3, %v937_v4 }
 0x156   : > { %v1396_v22 = vxor.u32 2147483648, %v1395_v7  ;;  %v860_v52 = vshll.u32 %v4105_v47, 30  ;;  %v947_v44 = vsel %vm933_vm2, %v944_v10, %v946_v12  ;;  %vm4132_vm8 = vcmp.le.f32.partialorder %v1312_v21, 0.7853982  ;;  %v2964_v12 = vld [vmem:[%s3181_s25 + $0x10] sm:$0xff] }
 0x157   : > { %v4124_v25 = vmul.u32.u64.low %v948_v1, %v947_v44  ;;  %v4125_v48 = vmul.u32.u64.high %v948_v1, %v947_v44, %v4124_v25  ;;  %v4127_v27 = vmul.u32.u64.low %v948_v1, %v943_v60  ;;  %v4128_v53 = vmul.u32.u64.high %v948_v1, %v943_v60, %v4127_v27  ;;  %v2963_v60 = vld [vmem:[%s3181_s25 + $0x8] sm:$0xff] }
 0x158   : > { %v1397_v56 = vsel %vm1314_vm1, %v1396_v22, %v1395_v7  ;;  %v861_v40 = vsub.s32 %v857_v9, %v860_v52  ;;  %v939_v45 = vsel %vm933_vm2, %v936_v30, %v938_v34  ;;  %v1399_v21 = vsel %vm1314_vm1, %v1398_v13, %v3994_v59 }
 0x159   : > { %v1400_v61 = vsel %vm4132_vm8, %v4491_v51, %v1397_v56  ;;  %v4149_v39 = vadd.s32 %v4127_v27, %v4125_v48  ;;  %vm957_vm12 = vc.u32 %v4125_v48, %v4127_v27  ;;  %v958_v37 = vadd.s32 1, %v4128_v53  ;;  %v2966_v56 = vld [vmem:[%s3181_s25 + $0x20] sm:$0xff] }
 0x15a   : > { %2916 = vcosq.f32 %v1400_v61  ;;  %v863_v29 = vsub.s32 0, %v861_v40  ;;  %v955_v58 = vmul.u32 %v948_v1, %v939_v45  ;;  %v1401_v55 = vsel %vm4132_vm8, 0, %v1399_v21  ;;  %v2967_v21 = vld [vmem:[%s3181_s25 + $0x28] sm:$0xff] }
 0x15b   : > { %2918 = vsinq.f32 %v1400_v61  ;;  %v959_v20 = vsel %vm957_vm12, %v958_v37, %v4128_v53  ;;  %v1405_v0 = vand.u32 3, %v1401_v55  ;;  %vm1404_vm5 = vweird.f32 %v4491_v51  ;;  %v2968_v37 = vld [vmem:[%s3181_s25 + $0x30] sm:$0xff] }
 0x15c   : > { %v2590_v18 = vmin.u32 %v863_v29, %v861_v40  ;;  %v960_v36 = vadd.s32 %v959_v20, %v955_v58  ;;  %vm1633_vm7 = vcmask 261120   ;;  %vm4170_vm1 = vcmp.le.f32.partialorder %v797_v41, 0.7853982  ;;  %v2965_v41 = vld [vmem:[%s3181_s25 + $0x18] sm:$0xff] }
 0x15d   : > { %vm1410_vm10 = vcmp.eq.s32.totalorder %v1405_v0, 2  ;;  %vm1406_vm3 = vcmp.lt.s32.totalorder %v1405_v0, 2  ;;  %vm1407_vm14 = vcmp.eq.s32.totalorder %v1405_v0, 0  ;;  %vm799_vm11 = vcmp.lt.s32.totalorder %v4508_v2, 0  ;;  %v2969_v20 = vld [vmem:[%s3181_s25 + $0x38] sm:$0xff] }
 0x15e   : > { %v865_v38 = vclz %v2590_v18  ;;  %v961_v13 = vadd.s32 536870912, %v960_v36  ;;  %v883_v34 = vsub.s32 4, %v4105_v47  ;;  %vm4201_vm15 = vcmp.le.f32.partialorder %v900_v26, 0.7853982 }
 0x15f   : > { %vm902_vm2 = vcmp.lt.s32.totalorder %v4513_v62, 0 }
 0x160   : > { %v2591_v59 = vadd.s32 4294967294, %v865_v38  ;;  %v4156_v28 = vshrl.u32 %v961_v13, 30 }
 0x162   : > { %vm2592_vm6 = vcmp.lt.s32.totalorder %v2591_v59, 0  ;;  %v963_v54 = vshll.u32 %v4156_v28, 30 }
 0x163   : > { %v868_v16 = vsel %vm2592_vm6, 0, %v2591_v59 }
 0x164   : > { %v2917_v24 = vpop.eup %2916  ;;  %v869_v3 = vsub.s32 32, %v868_v16  ;;  %v873_v43 = vsub.s32 4294967266, %v868_v16  ;;  %v870_v46 = vshll.u32 %v861_v40, %v868_v16  ;;  %v964_v9 = vsub.s32 %v960_v36, %v963_v54 }
 0x165   : > { %v2919_v17 = vpop.eup %2918  ;;  %v1411_v63 = vxor.u32 2147483648, %v2917_v24  ;;  %v884_v40 = vsel %vm799_vm11, %v883_v34, %v4105_v47  ;;  %v4518_v47 = vmov 0.0  }
 0x166   : > { %v1408_v50 = vxor.u32 2147483648, %v2919_v17  ;;  %v871_v42 = vshrl.u32 %v4074_v33, %v869_v3  ;;  %v874_v6 = vadd.s32 127, %v873_v43  ;;  %v966_v19 = vsub.s32 0, %v964_v9  ;;  %v2962_v33 = vld [vmem:[%s3181_s25] sm:$0xff] }
 0x167   : > { %v1412_v57 = vsel %vm1410_vm10, %v1411_v63, %v2919_v17  ;;  %v986_v43 = vsub.s32 4, %v4156_v28  ;;  %vm889_vm10 = vweird.f32 %v4508_v2 }
 0x168   : > { %v1409_v14 = vsel %vm1407_vm14, %v2917_v24, %v1408_v50  ;;  %v872_v8 = vor.u32 %v871_v42, %v870_v46  ;;  %v875_v49 = vshll.u32 %v874_v6, 23  ;;  %v2594_v4 = vmin.u32 %v966_v19, %v964_v9 }
 0x169   : > { %v1413_v15 = vsel %vm1406_vm3, %v1409_v14, %v1412_v57  ;;  %v987_v50 = vsel %vm902_vm2, %v986_v43, %v4156_v28 }
 0x16a   : > { %v1414_v35 = vsel %vm1404_vm5, nan, %v1413_v15  ;;  %v876_v31 = vor.u32 4788187, %v875_v49  ;;  %v879_v10 = vcvt.s32.f32 %v872_v8  ;;  %v968_v11 = vclz %v2594_v4  ;;  %v1869_v4 = vld [vmem:[%s4413_s14 + $0x8] sm:$0xff] }
 0x16b   : > { %2712 = vmatmul.mubr.msk.f32.gmra.mrb[2].mxu1 %vm1503_vm4, %v1414_v35  ;;  %v989_v42 = vsel %vm4201_vm15, 0, %v987_v50 }
 0x16c   : > { %2722 = vmatprep.mubr.msk.f32.mxu1 %vm1633_vm7, %v2962_v33  ;;  %v877_v5 = vand.u32 2147483647, %v876_v31  ;;  %v2595_v30 = vadd.s32 4294967294, %v968_v11  ;;  %v993_v6 = vand.u32 3, %v989_v42  ;;  %v1868_v31 = vld [vmem:[%s4413_s14] sm:$0xff] }
 0x16d   : > { %v2783_v33 = vpack.c.bf16 %v1869_v4, %v1868_v31 }
 0x16e   : > { %v880_v7 = vmul.f32 %v879_v10, %v877_v5  ;;  %vm2596_vm9 = vcmp.lt.s32.totalorder %v2595_v30, 0  ;;  %vm998_vm3 = vcmp.eq.s32.totalorder %v993_v6, 2  ;;  %vm995_vm14 = vcmp.eq.s32.totalorder %v993_v6, 0  ;;  %v1871_v5 = vld [vmem:[%s4413_s14 + $0x18] sm:$0xff] }
 0x16f   : > { %2723 = vmatmul.mubr.msk.f32.vlgmr.msra.gmra.mrb[4].mxu1 %vm1633_vm7, %v2963_v60  ;;  %v971_v22 = vsel %vm2596_vm9, 0, %v2595_v30  ;;  %vm994_vm5 = vcmp.lt.s32.totalorder %v993_v6, 2  ;;  %vm992_vm9 = vweird.f32 %v4513_v62  ;;  %2784 = vmatprep.subr.bf16.mxu0 %v2783_v33  ;;  %v3045_v30 = vmov 1966171168  }
 0x170   : > { %v881_v51 = vxor.u32 2147483648, %v880_v7  ;;  %2725 = vmatprep.mubr.msk.f32.mxu1 %vm1633_vm7, %v2964_v12  ;;  %v972_v44 = vsub.s32 32, %v971_v22  ;;  %v976_v25 = vsub.s32 4294967266, %v971_v22  ;;  %v973_v27 = vshll.u32 %v964_v9, %v971_v22  ;;  %2786 = vmatpush3.bf16.msra.mxu0 %v2783_v33  ;;  %v2613_v22 = vld [vmem:[%s4404_s5] ss:$0 sm:$0xff] }
 0x171   : > { %v1773_v60 = vunpack.c.l.s4 %v3045_v30 }
 0x172   : > { %v882_v52 = vsel %vm799_vm11, %v881_v51, %v880_v7  ;;  %v974_v53 = vshrl.u32 %v4149_v39, %v972_v44  ;;  %v977_v23 = vadd.s32 127, %v976_v25  ;;  %v886_v39 = vsel %vm4170_vm1, 0, %v884_v40 }
 0x173   : > { %v885_v48 = vsel %vm4170_vm1, %v4508_v2, %v882_v52  ;;  %2726 = vmatmul.mubr.msk.f32.gmra.mrb[6].mxu1 %vm1633_vm7, %v2965_v41  ;;  %v890_v55 = vand.u32 3, %v886_v39  ;;  %v1775_v51 = vlaneseq  ;;  %v1774_v12 = vunpack.c.0.s8 %v1773_v60 }
 0x174   : > { %2920 = vcosq.f32 %v885_v48  ;;  %2728 = vmatprep.mubr.msk.f32.mxu1 %vm1633_vm7, %v2966_v56  ;;  %v975_v61 = vor.u32 %v974_v53, %v973_v27  ;;  %v978_v45 = vshll.u32 %v977_v23, 23  ;;  %v2631_v23 = vld [vmem:[%s4407_s8] ss:$0 sm:$0xff] }
 0x175   : > { %2922 = vsinq.f32 %v885_v48  ;;  %vm895_vm8 = vcmp.eq.s32.totalorder %v890_v55, 2  ;;  %vm892_vm12 = vcmp.eq.s32.totalorder %v890_v55, 0  ;;  %vm891_vm6 = vcmp.lt.s32.totalorder %v890_v55, 2 }
 0x176   : > { %v979_v29 = vor.u32 4788187, %v978_v45  ;;  %v982_v58 = vcvt.s32.f32 %v975_v61  ;;  %v1776_v1 = vshrl.u32 %v1775_v51, 7 }
 0x177   : > { %2729 = vmatmul.mubr.msk.f32.gmra.mrb[0].mxu1 %vm1633_vm7, %v2967_v21 }
 0x178   : > { %2731 = vmatprep.mubr.msk.f32.mxu1 %vm1633_vm7, %v2968_v37  ;;  %v980_v18 = vand.u32 2147483647, %v979_v29  ;;  %v1777_v34 = vsub.s32 %v1774_v12, %v1776_v1  ;;  %v1822_v41 = vsub.s32 0, %v1776_v1 }
 0x17a   : > { %v983_v38 = vmul.f32 %v982_v58, %v980_v18 }
 0x17b   : > { %2732 = vmatmul.mubr.msk.f32.gmra.mrb[2].mxu1 %vm1633_vm7, %v2969_v20 }
 0x17c   : > { %2769 = vmatprep.mubr.msk.f32.mxu1 %vm3037_vm0, %v4518_v47  ;;  %v984_v59 = vxor.u32 2147483648, %v983_v38 }
 0x17e   : > { %v2921_v36 = vpop.eup %2920  ;;  %v985_v3 = vsel %vm902_vm2, %v984_v59, %v983_v38 }
 0x17f   : > { %v2923_v13 = vpop.eup %2922  ;;  %v896_v0 = vxor.u32 2147483648, %v2921_v36  ;;  %v988_v17 = vsel %vm4201_vm15, %v4513_v62, %v985_v3  ;;  %v1870_v62 = vld [vmem:[%s4413_s14 + $0x10] sm:$0xff] }
 0x180   : > { %v893_v24 = vxor.u32 2147483648, %v2923_v13  ;;  %2924 = vcosq.f32 %v988_v17  ;;  %v2787_v10 = vpack.c.bf16 %v1871_v5, %v1870_v62 }
 0x181   : > { %v897_v54 = vsel %vm895_vm8, %v896_v0, %v2923_v13  ;;  %2926 = vsinq.f32 %v988_v17 }
 0x182   : > { %v894_v63 = vsel %vm892_vm12, %v2921_v36, %v893_v24  ;;  %2788 = vmatprep.subr.bf16.mxu0 %v2787_v10 }
 0x183   : > { %v898_v26 = vsel %vm891_vm6, %v894_v63, %v897_v54  ;;  %2790 = vmatpush3.bf16.msra.mxu0 %v2787_v10  ;;  %vm2217_vm6 = vcmask 523520  }
 0x184   : > { %v899_v46 = vsel %vm889_vm10, nan, %v898_v26  ;;  %2791 = vmatprep.subr.bf16.mxu0 %v4509_v32  ;;  %vm2360_vm10 = vcmask 1042434  }
 0x185   : > { %2705 = vmatprep.mubr.msk.f32.mxu0 %vm1503_vm4, %v899_v46 }
 0x18a   : > { %v2925_v9 = vpop.eup %2924 }
 0x18b   : > { %v2927_v57 = vpop.eup %2926  ;;  %v999_v14 = vxor.u32 2147483648, %v2925_v9 }
 0x18c   : > { %v996_v8 = vxor.u32 2147483648, %v2927_v57 }
 0x18d   : > { %v1000_v49 = vsel %vm998_vm3, %v999_v14, %v2927_v57  ;;  %vm2362_vm3 = vcmask 1043459  }
 0x18e   : > { %v997_v2 = vsel %vm995_vm14, %v2925_v9, %v996_v8  ;;  %vm2364_vm14 = vcmask 1044484  }
 0x18f   : > { %v1001_v19 = vsel %vm994_vm5, %v997_v2, %v1000_v49  ;;  %vm2366_vm5 = vcmask 1045509  }
 0x190   : > { %v1002_v15 = vsel %vm992_vm9, nan, %v1001_v19  ;;  %vm2368_vm9 = vcmask 1046534  }
 0x191   : > { %2706 = vmatmul.mubr.msk.f32.gmra.mrb[4].mxu0 %vm1503_vm4, %v1002_v15 }
 0x1be   : > { %v1494_v28 = vpop.f32.mrb[0].mxu0 }
 0x1bf   : > { %v2699_v35 = vpop.f32.mrb[1].mxu0  ;;  %v1495_v52 = vadd.f32 %v2613_v22, %v1494_v28 }
 0x1c1   : > { %v1778_v44 = vrot.slane %v1495_v52, %v1777_v34  ;;  %v1771_v13 = vcombine.high %v1495_v52, %v1495_v52 }
 0x1c3   : > { %v1786_v25 = vcombine.high %v1778_v44, %v1778_v44  ;;  %v1794_v48 = vrot.slane %v1778_v44, %v1777_v34  ;;  %v1785_v0 = vrot.slane %v1771_v13, %v1777_v34 }
 0x1c5   : > { %v1808_v27 = vrot.slane %v1786_v25, %v1777_v34  ;;  %v1823_v45 = vrot.slane %v1794_v48, %v1822_v41  ;;  %v1816_v24 = vcombine.high %v1794_v48, %v1794_v48  ;;  %v1801_v43 = vrot.slane %v1785_v0, %v1777_v34 }
 0x1c6   : > { %v1787_v54 = vcombine.high %v1785_v0, %v1785_v0 }
 0x1c7   : > { %v1827_v29 = vrot.slane %v1808_v27, %v1822_v41  ;;  %v1818_v16 = vcombine.high %v1808_v27, %v1808_v27  ;;  %v1831_v9 = vrot.slane %v1816_v24, %v1822_v41  ;;  %v1839_v57 = vrot.slane %v1801_v43, %v1822_v41 }
 0x1c8   : > { %v1817_v14 = vcombine.high %v1801_v43, %v1801_v43  ;;  %v1815_v8 = vrot.slane %v1787_v54, %v1777_v34 }
 0x1c9   : > { %v1835_v42 = vrot.slane %v1818_v16, %v1822_v41 }
 0x1ca   : > { %v1847_v35 = vrot.slane %v1817_v14, %v1822_v41  ;;  %v1843_v31 = vrot.slane %v1815_v8, %v1822_v41  ;;  %v1819_v4 = vcombine.high %v1815_v8, %v1815_v8 }
 0x1cc   : > { %v1851_v10 = vrot.slane %v1819_v4, %v1822_v41 }
 0x228   : > { %v2704_v11 = vpop.f32.mrb[2].mxu0 }
 0x229   : > { %v1594_v7 = vpop.f32.mrb[3].mxu0 }
 0x242   : > { %v2724_v53 = vpop.f32.mrb[4].mxu1 }
 0x243   : > { %v1722_v56 = vadd.f32 %v2724_v53, %v2704_v11  ;;  %v1716_v40 = vpop.f32.mrb[5].mxu1 }
 0x244   : > { %v1717_v61 = vadd.f32 %v1716_v40, %v1594_v7 }
 0x245   : > { %v4236_v21 = vadd.f32 %v2631_v23, %v1722_v56 }
 0x246   : > { %v4238_v37 = vadd.f32 %v2631_v23, %v1717_v61  ;;  %v2727_v39 = vpop.f32.mrb[6].mxu1 }
 0x247   : > { %v1726_v18 = vpop.f32.mrb[7].mxu1  ;;  %v1861_v20 = vmul.f32 %v1827_v29, %v4236_v21 }
 0x248   : > { %v1860_v58 = vmul.f32 %v1823_v45, %v4238_v37 }
 0x24a   : > { %v2730_v55 = vpop.f32.mrb[0].mxu1  ;;  %2742 = vmatprep.mubr.msk.f32.mxu0 %vm1633_vm7, %v1860_v58 }
 0x24b   : > { %v1736_v38 = vpop.f32.mrb[1].mxu1  ;;  %2743 = vmatmul.mubr.msk.f32.vlgmr.msra.gmra.mrb[6].mxu0 %vm1633_vm7, %v1861_v20  ;;  %v4255_v28 = vadd.f32 %v2730_v55, %v2631_v23 }
 0x24c   : > { %v4244_v46 = vadd.f32 %v2631_v23, %v1736_v38 }
 0x24d   : > { %v1865_v62 = vmul.f32 %v1843_v31, %v4255_v28 }
 0x24e   : > { %v2733_v36 = vpop.f32.mrb[2].mxu1  ;;  %v1864_v2 = vmul.f32 %v1839_v57, %v4244_v46 }
 0x24f   : > { %v1746_v59 = vpop.f32.mrb[3].mxu1  ;;  %v4262_v5 = vadd.f32 %v2733_v36, %v2631_v23 }
 0x250   : > { %v4252_v19 = vadd.f32 %v2631_v23, %v1746_v59 }
 0x251   : > { %v1867_v11 = vmul.f32 %v1851_v10, %v4262_v5 }
 0x252   : > { %v1866_v33 = vmul.f32 %v1847_v35, %v4252_v19 }
 0x264   : > { %v2707_v3 = vpop.f32.mrb[4].mxu0 }
 0x265   : > { %v1604_v17 = vpop.f32.mrb[5].mxu0  ;;  %v1732_v63 = vadd.f32 %v2727_v39, %v2707_v3 }
 0x266   : > { %v1727_v26 = vadd.f32 %v1726_v18, %v1604_v17 }
 0x267   : > { %v4246_v50 = vadd.f32 %v2631_v23, %v1732_v63 }
 0x268   : > { %v4248_v6 = vadd.f32 %v2631_v23, %v1727_v26 }
 0x269   : > { %v1863_v15 = vmul.f32 %v1835_v42, %v4246_v50 }
 0x26a   : > { %v1862_v49 = vmul.f32 %v1831_v9, %v4248_v6 }
 0x26c   : > { %2745 = vmatprep.mubr.msk.f32.mxu0 %vm1633_vm7, %v1862_v49 }
 0x26d   : > { %2746 = vmatmul.mubr.msk.f32.gmra.mrb[8].mxu0 %vm1633_vm7, %v1863_v15 }
 0x26e   : > { %2748 = vmatprep.mubr.msk.f32.mxu0 %vm1633_vm7, %v1864_v2 }
 0x271   : > { %2749 = vmatmul.mubr.msk.f32.gmra.mrb[10].mxu0 %vm1633_vm7, %v1865_v62 }
 0x272   : > { %2751 = vmatprep.mubr.msk.f32.mxu0 %vm1633_vm7, %v1866_v33 }
 0x275   : > { %2752 = vmatmul.mubr.msk.f32.gmra.mrb[12].mxu0 %vm1633_vm7, %v1867_v11 }
 0x276   : > { %2758 = vmatprep.mubr.msk.f32.mxu0 %vm3037_vm0, %v4518_v47 }
 0x31e   : > { %v2744_v7 = vpop.f32.mrb[6].mxu0 }
 0x31f   : > { %vm2002_vm4 = vcmp.ge.f32.partialorder %v2744_v7, 0.0  ;;  %v2010_v30 = vmul.f32 0.2, %v2744_v7  ;;  %v1962_v60 = vpop.f32.mrb[7].mxu0 }
 0x320   : > { %vm2001_vm1 = vcmp.ge.f32.partialorder %v1962_v60, 0.0  ;;  %v2009_v51 = vmul.f32 0.2, %v1962_v60 }
 0x321   : > { %v2018_v12 = vsel %vm2002_vm4, %v2744_v7, %v2010_v30  ;;  %vm2370_vm4 = vcmask 1047559  }
 0x322   : > { %v2032_v1 = vsel %vm1633_vm7, %v2018_v12, -inf  ;;  %v2017_v22 = vsel %vm2001_vm1, %v1962_v60, %v2009_v51 }
 0x323   : > { %v2033_v52 = vrot.slane %v2032_v1, 4  ;;  %v2025_v34 = vsel %vm1633_vm7, %v2017_v22, -inf }
 0x324   : > { %v2026_v44 = vrot.slane %v2025_v34, 4 }
 0x325   : > { %v2034_v25 = vmax.f32 %v2032_v1, %v2033_v52 }
 0x326   : > { %v2027_v48 = vmax.f32 %v2025_v34, %v2026_v44 }
 0x327   : > { %v2035_v41 = vrot.slane %v2034_v25, 2 }
 0x328   : > { %v2028_v27 = vrot.slane %v2027_v48, 2 }
 0x329   : > { %v2036_v53 = vmax.f32 %v2034_v25, %v2035_v41 }
 0x32a   : > { %v2029_v47 = vmax.f32 %v2027_v48, %v2028_v27 }
 0x32b   : > { %v2037_v23 = vrot.slane %v2036_v53, 1 }
 0x32c   : > { %v2030_v56 = vrot.slane %v2029_v47, 1 }
 0x32d   : > { %v2038_v40 = vmax.f32 %v2036_v53, %v2037_v23 }
 0x32e   : > { %v2031_v61 = vmax.f32 %v2029_v47, %v2030_v56 }
 0x32f   : > { %v2082_v45 = vsub.f32 %v2018_v12, %v2038_v40 }
 0x330   : > { %v2081_v29 = vsub.f32 %v2017_v22, %v2031_v61 }
 0x331   : > { %v2091_v39 = vmul.f32 1.442695, %v2082_v45 }
 0x332   : > { %v2089_v18 = vmul.f32 1.442695, %v2081_v29 }
 0x333   : > { %2928 = vpow2.f32 %v2091_v39 }
 0x334   : > { %2930 = vpow2.f32 %v2089_v18 }
 0x33d   : > { %v4272_v58 = vpop.eup %2928 }
 0x33e   : > { %v4274_v20 = vpop.eup %2930  ;;  %v2112_v55 = vsel %vm1633_vm7, %v4272_v58, 0.0 }
 0x33f   : > { %v2113_v38 = vrot.slane %v2112_v55, 4  ;;  %v2105_v36 = vsel %vm1633_vm7, %v4274_v20, 0.0 }
 0x340   : > { %v2106_v59 = vrot.slane %v2105_v36, 4  ;;  %v2747_v16 = vpop.f32.mrb[8].mxu0 }
 0x341   : > { %v2114_v13 = vadd.f32 %v2113_v38, %v2112_v55  ;;  %vm2004_vm0 = vcmp.ge.f32.partialorder %v2747_v16, 0.0  ;;  %v2012_v24 = vmul.f32 0.2, %v2747_v16  ;;  %v1972_v3 = vpop.f32.mrb[9].mxu0 }
 0x342   : > { %v2107_v0 = vadd.f32 %v2106_v59, %v2105_v36  ;;  %vm2003_vm11 = vcmp.ge.f32.partialorder %v1972_v3, 0.0  ;;  %v2011_v54 = vmul.f32 0.2, %v1972_v3 }
 0x343   : > { %v2115_v43 = vrot.slane %v2114_v13, 2  ;;  %v2020_v63 = vsel %vm2004_vm0, %v2747_v16, %v2012_v24 }
 0x344   : > { %v2108_v17 = vrot.slane %v2107_v0, 2  ;;  %v2046_v42 = vsel %vm1633_vm7, %v2020_v63, -inf  ;;  %v2019_v9 = vsel %vm2003_vm11, %v1972_v3, %v2011_v54  ;;  %v2750_v57 = vpop.f32.mrb[10].mxu0 }
 0x345   : > { %v2116_v26 = vadd.f32 %v2115_v43, %v2114_v13  ;;  %v2047_v8 = vrot.slane %v2046_v42, 4  ;;  %v2039_v49 = vsel %vm1633_vm7, %v2019_v9, -inf  ;;  %vm2006_vm15 = vcmp.ge.f32.partialorder %v2750_v57, 0.0  ;;  %v1982_v15 = vpop.f32.mrb[11].mxu0 }
 0x346   : > { %v2109_v14 = vadd.f32 %v2108_v17, %v2107_v0  ;;  %v2014_v2 = vmul.f32 0.2, %v2750_v57  ;;  %v2040_v35 = vrot.slane %v2039_v49, 4  ;;  %vm2005_vm2 = vcmp.ge.f32.partialorder %v1982_v15, 0.0 }
 0x347   : > { %v2013_v31 = vmul.f32 0.2, %v1982_v15  ;;  %v2117_v4 = vrot.slane %v2116_v26, 1  ;;  %v2048_v33 = vmax.f32 %v2046_v42, %v2047_v8 }
 0x348   : > { %v2022_v62 = vsel %vm2006_vm15, %v2750_v57, %v2014_v2  ;;  %v2110_v10 = vrot.slane %v2109_v14, 1  ;;  %v2041_v11 = vmax.f32 %v2039_v49, %v2040_v35  ;;  %v2753_v60 = vpop.f32.mrb[12].mxu0 }
 0x349   : > { %v2060_v7 = vsel %vm1633_vm7, %v2022_v62, -inf  ;;  %v2021_v30 = vsel %vm2005_vm2, %v1982_v15, %v2013_v31  ;;  %v2118_v51 = vadd.f32 %v2117_v4, %v2116_v26  ;;  %v2049_v12 = vrot.slane %v2048_v33, 2  ;;  %v1992_v52 = vpop.f32.mrb[13].mxu0 }
 0x34a   : > { %v2061_v1 = vrot.slane %v2060_v7, 4  ;;  %v2053_v22 = vsel %vm1633_vm7, %v2021_v30, -inf  ;;  %vm2008_vm8 = vcmp.ge.f32.partialorder %v2753_v60, 0.0  ;;  %v2042_v34 = vrot.slane %v2041_v11, 2 }
 0x34b   : > { %v2054_v44 = vrot.slane %v2053_v22, 4  ;;  %v2016_v25 = vmul.f32 0.2, %v2753_v60  ;;  %vm2007_vm12 = vcmp.ge.f32.partialorder %v1992_v52, 0.0  ;;  %v2050_v48 = vmax.f32 %v2048_v33, %v2049_v12 }
 0x34c   : > { %v2062_v41 = vmax.f32 %v2060_v7, %v2061_v1  ;;  %v2015_v27 = vmul.f32 0.2, %v1992_v52  ;;  %2932 = vrcp.f32 %v2118_v51  ;;  %v2043_v53 = vmax.f32 %v2041_v11, %v2042_v34 }
 0x34d   : > { %v2055_v47 = vmax.f32 %v2053_v22, %v2054_v44  ;;  %v2024_v23 = vsel %vm2008_vm8, %v2753_v60, %v2016_v25  ;;  %v2111_v56 = vadd.f32 %v2110_v10, %v2109_v14  ;;  %v2051_v40 = vrot.slane %v2050_v48, 1 }
 0x34e   : > { %v2063_v61 = vrot.slane %v2062_v41, 2  ;;  %v2074_v45 = vsel %vm1633_vm7, %v2024_v23, -inf  ;;  %v2023_v29 = vsel %vm2007_vm12, %v1992_v52, %v2015_v27  ;;  %v2044_v39 = vrot.slane %v2043_v53, 1 }
 0x34f   : > { %v2056_v18 = vrot.slane %v2055_v47, 2  ;;  %v2075_v55 = vrot.slane %v2074_v45, 4  ;;  %v2067_v38 = vsel %vm1633_vm7, %v2023_v29, -inf  ;;  %v2052_v36 = vmax.f32 %v2050_v48, %v2051_v40 }
 0x350   : > { %v2064_v59 = vmax.f32 %v2062_v41, %v2063_v61  ;;  %v2068_v13 = vrot.slane %v2067_v38, 4  ;;  %2934 = vrcp.f32 %v2111_v56  ;;  %v2045_v0 = vmax.f32 %v2043_v53, %v2044_v39 }
 0x351   : > { %v2057_v16 = vmax.f32 %v2055_v47, %v2056_v18  ;;  %v2076_v24 = vmax.f32 %v2074_v45, %v2075_v55  ;;  %v2084_v3 = vsub.f32 %v2020_v63, %v2052_v36 }
 0x352   : > { %v2065_v43 = vrot.slane %v2064_v59, 1  ;;  %v2069_v54 = vmax.f32 %v2067_v38, %v2068_v13  ;;  %v2083_v17 = vsub.f32 %v2019_v9, %v2045_v0 }
 0x353   : > { %v2058_v26 = vrot.slane %v2057_v16, 1  ;;  %v2077_v42 = vrot.slane %v2076_v24, 2  ;;  %v2095_v57 = vmul.f32 1.442695, %v2084_v3 }
 0x354   : > { %v2066_v14 = vmax.f32 %v2064_v59, %v2065_v43  ;;  %v2070_v8 = vrot.slane %v2069_v54, 2  ;;  %v2093_v49 = vmul.f32 1.442695, %v2083_v17 }
 0x355   : > { %v2059_v2 = vmax.f32 %v2057_v16, %v2058_v26  ;;  %v2078_v15 = vmax.f32 %v2076_v24, %v2077_v42  ;;  %2936 = vpow2.f32 %v2095_v57 }
 0x356   : > { %v2933_v35 = vpop.eup %2932  ;;  %v2086_v31 = vsub.f32 %v2022_v62, %v2066_v14  ;;  %v2071_v4 = vmax.f32 %v2069_v54, %v2070_v8  ;;  %2938 = vpow2.f32 %v2093_v49 }
 0x357   : > { %v2085_v33 = vsub.f32 %v2021_v30, %v2059_v2  ;;  %v2079_v10 = vrot.slane %v2078_v15, 1  ;;  %v2164_v63 = vmul.f32 %v2933_v35, %v4272_v58 }
 0x358   : > { %v2099_v11 = vmul.f32 1.442695, %v2086_v31  ;;  %v2072_v7 = vrot.slane %v2071_v4, 1 }
 0x359   : > { %v2097_v9 = vmul.f32 1.442695, %v2085_v33  ;;  %v2080_v60 = vmax.f32 %v2078_v15, %v2079_v10  ;;  %2187 = vrot.lane.b32.xlu1 %v2164_v63, %s3046_s17 }
 0x35a   : > { %v2935_v51 = vpop.eup %2934  ;;  %2940 = vpow2.f32 %v2099_v11  ;;  %v2073_v12 = vmax.f32 %v2071_v4, %v2072_v7 }
 0x35b   : > { %2942 = vpow2.f32 %v2097_v9  ;;  %v2088_v1 = vsub.f32 %v2024_v23, %v2080_v60  ;;  %v2162_v62 = vmul.f32 %v2935_v51, %v4274_v20 }
 0x35c   : > { %v2087_v22 = vsub.f32 %v2023_v29, %v2073_v12 }
 0x35d   : > { %v2103_v52 = vmul.f32 1.442695, %v2088_v1  ;;  %2185 = vrot.lane.b32.xlu0 %v2162_v62, %s3046_s17 }
 0x35e   : > { %v2101_v30 = vmul.f32 1.442695, %v2087_v22 }
 0x35f   : > { %2944 = vpow2.f32 %v2103_v52  ;;  %v2937_v58 = vpop.eup %2936 }
 0x360   : > { %2946 = vpow2.f32 %v2101_v30  ;;  %v2939_v34 = vpop.eup %2938  ;;  %v2126_v44 = vsel %vm1633_vm7, %v2937_v58, 0.0 }
 0x361   : > { %v2127_v25 = vrot.slane %v2126_v44, 4  ;;  %v2119_v48 = vsel %vm1633_vm7, %v2939_v34, 0.0 }
 0x362   : > { %v2120_v41 = vrot.slane %v2119_v48, 4 }
 0x363   : > { %v2128_v53 = vadd.f32 %v2127_v25, %v2126_v44 }
 0x364   : > { %v2941_v27 = vpop.eup %2940  ;;  %v2121_v23 = vadd.f32 %v2120_v41, %v2119_v48 }
 0x365   : > { %v2943_v47 = vpop.eup %2942  ;;  %v2140_v20 = vsel %vm1633_vm7, %v2941_v27, 0.0  ;;  %v2129_v61 = vrot.slane %v2128_v53, 2 }
 0x366   : > { %v2141_v56 = vrot.slane %v2140_v20, 4  ;;  %v2133_v40 = vsel %vm1633_vm7, %v2943_v47, 0.0  ;;  %v2122_v29 = vrot.slane %v2121_v23, 2 }
 0x367   : > { %v2134_v45 = vrot.slane %v2133_v40, 4  ;;  %v2130_v18 = vadd.f32 %v2129_v61, %v2128_v53 }
 0x368   : > { %v2142_v39 = vadd.f32 %v2141_v56, %v2140_v20  ;;  %v2123_v36 = vadd.f32 %v2122_v29, %v2121_v23  ;;  %v2275_v23 = vld [vmem:[%s4408_s9 + $0x8] sm:$0xff]  ;;  %v2276_v20 = vld [vmem:[%s4408_s9 + $0x10] sm:$0xff]  ;;  %v2277_v56 = vld [vmem:[%s4408_s9 + $0x18] sm:$0xff] }
 0x369   : > { %v2945_v55 = vpop.eup %2944  ;;  %v2135_v38 = vadd.f32 %v2134_v45, %v2133_v40  ;;  %v2131_v0 = vrot.slane %v2130_v18, 1  ;;  %v2798_v61 = vpack.c.bf16 %v2277_v56, %v2276_v20  ;;  %v2970_v45 = vld [vmem:[%s3554_s16] sm:$0xff]  ;;  %s499_s16 = sand.u32 1, %s3025_s19  }
 0x36a   : > { %v2947_v59 = vpop.eup %2946  ;;  %v2154_v13 = vsel %vm1633_vm7, %v2945_v55, 0.0  ;;  %v2143_v16 = vrot.slane %v2142_v39, 2  ;;  %v2124_v43 = vrot.slane %v2123_v36, 1  ;;  %s2575_s20 = sshll.u32 %s499_s16, 3  ;;  %s2487_s27 = scalar_lea.sflag [#allocation3], %s499_s16 }
 0x36b   : > { %v2155_v24 = vrot.slane %v2154_v13, 4  ;;  %v2147_v3 = vsel %vm1633_vm7, %v2947_v59, 0.0  ;;  %v2136_v54 = vrot.slane %v2135_v38, 2  ;;  %v2132_v26 = vadd.f32 %v2131_v0, %v2130_v18 }
 0x36c   : > { %v2148_v17 = vrot.slane %v2147_v3, 4  ;;  %v2144_v42 = vadd.f32 %v2143_v16, %v2142_v39  ;;  %v2125_v14 = vadd.f32 %v2124_v43, %v2123_v36 }
 0x36d   : > { %v2156_v57 = vadd.f32 %v2155_v24, %v2154_v13  ;;  %v2137_v8 = vadd.f32 %v2136_v54, %v2135_v38  ;;  %2948 = vrcp.f32 %v2132_v26 }
 0x36e   : > { %v2149_v49 = vadd.f32 %v2148_v17, %v2147_v3  ;;  %v2145_v2 = vrot.slane %v2144_v42, 1  ;;  %2950 = vrcp.f32 %v2125_v14 }
 0x36f   : > { %v2138_v15 = vrot.slane %v2137_v8, 1  ;;  %v2157_v35 = vrot.slane %v2156_v57, 2 }
 0x370   : > { %v2146_v31 = vadd.f32 %v2145_v2, %v2144_v42  ;;  %v2150_v4 = vrot.slane %v2149_v49, 2 }
 0x371   : > { %v2139_v33 = vadd.f32 %v2138_v15, %v2137_v8  ;;  %v2158_v10 = vadd.f32 %v2157_v35, %v2156_v57 }
 0x372   : > { %2952 = vrcp.f32 %v2146_v31  ;;  %v2151_v63 = vadd.f32 %v2150_v4, %v2149_v49 }
 0x373   : > { %2954 = vrcp.f32 %v2139_v33  ;;  %v2159_v11 = vrot.slane %v2158_v10, 1 }
 0x374   : > { %v2152_v7 = vrot.slane %v2151_v63, 1 }
 0x375   : > { %v2160_v9 = vadd.f32 %v2159_v11, %v2158_v10 }
 0x376   : > { %v2153_v60 = vadd.f32 %v2152_v7, %v2151_v63 }
 0x377   : > { %2956 = vrcp.f32 %v2160_v9  ;;  %v2949_v51 = vpop.eup %2948 }
 0x378   : > { %2958 = vrcp.f32 %v2153_v60  ;;  %v2951_v12 = vpop.eup %2950  ;;  %v2168_v1 = vmul.f32 %v2949_v51, %v2937_v58  ;;  %v2278_v58 = vld [vmem:[%s4409_s10] sm:$0xff] }
 0x379   : > { %v2166_v62 = vmul.f32 %v2951_v12, %v2939_v34  ;;  %v2279_v34 = vld [vmem:[%s4409_s10 + $0x8] sm:$0xff] }
 0x37a   : > { %2191 = vrot.lane.b32.xlu1 %v2168_v1, %s3046_s17 }
 0x37b   : > { %2189 = vrot.lane.b32.xlu0 %v2166_v62, %s3046_s17 }
 0x37c   : > { %v2953_v22 = vpop.eup %2952 }
 0x37d   : > { %v2955_v52 = vpop.eup %2954  ;;  %v2172_v30 = vmul.f32 %v2953_v22, %v2941_v27  ;;  %v2274_v27 = vld [vmem:[%s4408_s9] sm:$0xff] }
 0x37e   : > { %v2170_v44 = vmul.f32 %v2955_v52, %v2943_v47  ;;  %v2792_v47 = vpack.c.bf16 %v2279_v34, %v2278_v58  ;;  %v2795_v40 = vpack.c.bf16 %v2275_v23, %v2274_v27 }
 0x37f   : > { %2195 = vrot.lane.b32.xlu1 %v2172_v30, %s3046_s17 }
 0x380   : > { %2193 = vrot.lane.b32.xlu0 %v2170_v44, %s3046_s17  ;;  %2793 = vmatpush3.bf16.msra.mxu0 %v2792_v47 }
 0x381   : > { %v2957_v25 = vpop.eup %2956  ;;  %2796 = vmatpush3.bf16.msra.mxu1 %v2795_v40 }
 0x382   : > { %v2959_v48 = vpop.eup %2958  ;;  %v2176_v41 = vmul.f32 %v2957_v25, %v2945_v55  ;;  %2797 = vmatprep.subr.bf16.mxu1 %v4509_v32 }
 0x383   : > { %v2174_v53 = vmul.f32 %v2959_v48, %v2947_v59  ;;  %2759 = vmatmul.mubr.msk.f32.vlgmr.msra.gmra.mrb[14].mxu0 %vm1424_vm13, %v2970_v45  ;;  %vm2358_vm13 = vcmask 1041409  }
 0x384   : > { %2199 = vrot.lane.b32.xlu1 %v2176_v41, %s3046_s17 }
 0x385   : > { %2197 = vrot.lane.b32.xlu0 %v2174_v53, %s3046_s17  ;;  %2799 = vmatpush3.bf16.msra.mxu1 %v2798_v61  ;;  %s501_s17 = scalar_lea.vmem [#allocation2], %s2575_s20  ;;  %s2975_s20 = sshll.u32 %s3048_s22, 4  ;;  %s2976_s20 = int_to_ptr.vmem [resolvable:$false] %s2975_s20 }
 0x386   : > { %s2500_s1 = sshll.u32 %s501_s17, 4  ;;  %s2977_s23 = scalar_lea.vmem %s2976_s20, 256  ;;  %s4358_s1 = int_to_ptr.vmem [resolvable:$true] %s2500_s1 }
 0x387   : > { %s2971_s25 = scalar_lea.vmem %s4358_s1, 128  ;;  %p2978_p1 = scmp.lt.s32.totalorder %s4358_s1, %s2976_s20 }
 0x388   : > { %p2972_p12 = scmp.ne.s32.totalorder %s4358_s1, %s2971_s25  ;;  %p2979_p2 = scmp.lt.s32.totalorder %s2977_s23, %s2971_s25 }
 0x38a   : > { %p2973_p13 = pnand %p2972_p12, %p3167_p5  ;;  %p2980_p3 = por %p2979_p2, %p2978_p1 }
 0x38c   : > { %p2974_p0 = pneg %p2973_p13 }
 0x38e   : > { %p2981_p4 = pnand %p2980_p3, %p2974_p0 }
 0x3cb   : > { %v2188_v29 = vpop.permute.xlu1 %2187 }
 0x3cc   : > { %v2210_v18 = vmul.f32 %v2188_v29, %v4236_v21 }
 0x3ce   : > { %v2225_v38 = vsel %vm2217_vm6, %v2210_v18, 0.0 }
 0x3cf   : > { %v2186_v39 = vpop.permute.xlu0 %2185  ;;  %v2226_v59 = vrot.slane %v2225_v38, 4 }
 0x3d0   : > { %v2209_v55 = vmul.f32 %v2186_v39, %v4238_v37 }
 0x3d1   : > { %v2227_v0 = vadd.f32 %v2226_v59, %v2225_v38 }
 0x3d2   : > { %v2218_v36 = vsel %vm2217_vm6, %v2209_v55, 0.0 }
 0x3d3   : > { %v2219_v13 = vrot.slane %v2218_v36, 4  ;;  %v2228_v32 = vrot.slane %v2227_v0, 2 }
 0x3d5   : > { %v2220_v16 = vadd.f32 %v2219_v13, %v2218_v36  ;;  %v2229_v21 = vadd.f32 %v2228_v32, %v2227_v0 }
 0x3d7   : > { %v2221_v24 = vrot.slane %v2220_v16, 2  ;;  %v2230_v31 = vrot.slane %v2229_v21, 1 }
 0x3d9   : > { %v2222_v37 = vadd.f32 %v2221_v24, %v2220_v16  ;;  %v2231_v22 = vadd.f32 %v2230_v31, %v2229_v21 }
 0x3ec   : > { %v2192_v3 = vpop.permute.xlu1 %2191 }
 0x3ed   : > { %v2212_v43 = vmul.f32 %v2192_v3, %v4246_v50  ;;  %v2190_v54 = vpop.permute.xlu0 %2189 }
 0x3ee   : > { %v2211_v17 = vmul.f32 %v2190_v54, %v4248_v6  ;;  %v2223_v6 = vrot.slane %v2222_v37, 1 }
 0x3ef   : > { %v2239_v26 = vsel %vm2217_vm6, %v2212_v43, 0.0 }
 0x3f0   : > { %v2240_v42 = vrot.slane %v2239_v26, 4  ;;  %v2232_v57 = vsel %vm2217_vm6, %v2211_v17, 0.0  ;;  %v2224_v52 = vadd.f32 %v2223_v6, %v2222_v37 }
 0x3f1   : > { %v2196_v14 = vpop.permute.xlu1 %2195  ;;  %v2233_v8 = vrot.slane %v2232_v57, 4 }
 0x3f2   : > { %v2214_v49 = vmul.f32 %v2196_v14, %v4255_v28  ;;  %v2194_v2 = vpop.permute.xlu0 %2193  ;;  %v2241_v15 = vadd.f32 %v2240_v42, %v2239_v26  ;;  %v2642_v42 = vld [vmem:[%s4410_s11] ss:$0 sm:$0xff] }
 0x3f3   : > { %v2213_v35 = vmul.f32 %v2194_v2, %v4244_v46  ;;  %v2234_v50 = vadd.f32 %v2233_v8, %v2232_v57 }
 0x3f4   : > { %v2253_v4 = vsel %vm2217_vm6, %v2214_v49, 0.0  ;;  %v2242_v33 = vrot.slane %v2241_v15, 2 }
 0x3f5   : > { %v2254_v10 = vrot.slane %v2253_v4, 4  ;;  %v2246_v63 = vsel %vm2217_vm6, %v2213_v35, 0.0  ;;  %v2235_v11 = vrot.slane %v2234_v50, 2 }
 0x3f6   : > { %v2247_v7 = vrot.slane %v2246_v63, 4  ;;  %v2200_v9 = vpop.permute.xlu1 %2199  ;;  %v2243_v60 = vadd.f32 %v2242_v33, %v2241_v15 }
 0x3f7   : > { %v2255_v51 = vadd.f32 %v2254_v10, %v2253_v4  ;;  %v2216_v28 = vmul.f32 %v2200_v9, %v4262_v5  ;;  %v2198_v12 = vpop.permute.xlu0 %2197  ;;  %v2236_v1 = vadd.f32 %v2235_v11, %v2234_v50  ;;  %v2643_v11 = vld [vmem:[%s4411_s12] ss:$0 sm:$0xff] }
 0x3f8   : > { %v2248_v62 = vadd.f32 %v2247_v7, %v2246_v63  ;;  %v2215_v46 = vmul.f32 %v2198_v12, %v4252_v19  ;;  %v2244_v58 = vrot.slane %v2243_v60, 1  ;;  %v2359_v19 = vsel %vm2358_vm13, %v2231_v22, %v2224_v52  ;;  %v2644_v9 = vld [vmem:[%s4412_s13] ss:$0 sm:$0xff] }
 0x3f9   : > { %v2256_v30 = vrot.slane %v2255_v51, 2  ;;  %v2267_v44 = vsel %vm2217_vm6, %v2216_v28, 0.0  ;;  %v2237_v25 = vrot.slane %v2236_v1, 1 }
 0x3fa   : > { %v2249_v48 = vrot.slane %v2248_v62, 2  ;;  %v2268_v41 = vrot.slane %v2267_v44, 4  ;;  %v2260_v53 = vsel %vm2217_vm6, %v2215_v46, 0.0  ;;  %v2245_v29 = vadd.f32 %v2244_v58, %v2243_v60 }
 0x3fb   : > { %v2261_v34 = vrot.slane %v2260_v53, 4  ;;  %v2238_v5 = vadd.f32 %v2237_v25, %v2236_v1  ;;  %v2257_v27 = vadd.f32 %v2256_v30, %v2255_v51 }
 0x3fc   : > { %v2250_v47 = vadd.f32 %v2249_v48, %v2248_v62  ;;  %v2269_v23 = vadd.f32 %v2268_v41, %v2267_v44 }
 0x3fd   : > { %v2262_v20 = vadd.f32 %v2261_v34, %v2260_v53  ;;  %v2361_v61 = vsel %vm2360_vm10, %v2238_v5, %v2359_v19  ;;  %v2258_v39 = vrot.slane %v2257_v27, 1 }
 0x3fe   : > { %v2251_v56 = vrot.slane %v2250_v47, 1  ;;  %v2270_v40 = vrot.slane %v2269_v23, 2  ;;  %v2363_v59 = vsel %vm2362_vm3, %v2245_v29, %v2361_v61 }
 0x3ff   : > { %v2263_v45 = vrot.slane %v2262_v20, 2  ;;  %v2259_v16 = vadd.f32 %v2258_v39, %v2257_v27 }
 0x400   : > { %v2252_v18 = vadd.f32 %v2251_v56, %v2250_v47  ;;  %v2271_v55 = vadd.f32 %v2270_v40, %v2269_v23 }
 0x401   : > { %v2264_v38 = vadd.f32 %v2263_v45, %v2262_v20 }
 0x402   : > { %v2272_v36 = vrot.slane %v2271_v55, 1  ;;  %v2365_v0 = vsel %vm2364_vm14, %v2252_v18, %v2363_v59 }
 0x403   : > { %v2265_v13 = vrot.slane %v2264_v38, 1  ;;  %v2367_v3 = vsel %vm2366_vm5, %v2259_v16, %v2365_v0 }
 0x404   : > { %v2273_v24 = vadd.f32 %v2272_v36, %v2271_v55 }
 0x405   : > { %v2266_v32 = vadd.f32 %v2265_v13, %v2264_v38 }
 0x407   : > { %v2369_v43 = vsel %vm2368_vm9, %v2266_v32, %v2367_v3 }
 0x408   : > { %v2371_v54 = vsel %vm2370_vm4, %v2273_v24, %v2369_v43 }
 0x409   : > { %2372 = vrot.lane.b32.xlu0 %v2371_v54, %s3047_s0 }
 0x456   : > { %v2346_v17 = vpop.f32.mrb[14].mxu0 }
 0x457   : > { %v2760_v21 = vpop.f32.mrb[15].mxu0 }
 0x47b   : > { %v2373_v26 = vpop.permute.xlu0 %2372 }
 0x47c   : > { %2770 = vmatmul.mubr.msk.f32.vlgmr.msra.gmra.mrb[8].mxu1 %vm1633_vm7, %v2373_v26 }
 0x54f   : > { %v2442_v37 = vpop.f32.mrb[8].mxu1 }
 0x550   : > { %v2443_v57 = vadd.f32 %v2442_v37, %v2346_v17  ;;  %v2771_v14 = vpop.f32.mrb[9].mxu1 }
 0x552   : > { %v2453_v8 = vadd.f32 %v2642_v42, %v2443_v57 }
 0x554   : > { %v2454_v49 = vmax.f32 %v2453_v8, 0.0 }
 0x556   : > { %v2455_v2 = vsel %vm1633_vm7, %v2454_v49, 0.0 }
 0x557   : > { %2456 = vadd.xlane.f32.xlu1 %v2455_v2 }
 0x5e4   : > { %v2457_v15 = vpop.xlane.xlu1 %2456 }
 0x5e5   : > { %v2459_v35 = vmul.f32 0.03125, %v2457_v15 }
 0x5e7   : > { %v2460_v31 = vsub.f32 %v2454_v49, %v2459_v35 }
 0x5e9   : > { %v2461_v50 = vmul.f32 %v2460_v31, %v2460_v31 }
 0x5eb   : > { %v2462_v4 = vsel %vm1633_vm7, %v2461_v50, 0.0 }
 0x5ec   : > { %2463 = vadd.xlane.f32.xlu0 %v2462_v4 }
 0x679   : > { %v2464_v6 = vpop.xlane.xlu0 %2463 }
 0x67a   : > { %v2465_v33 = vmul.f32 0.03125, %v2464_v6 }
 0x67c   : > { %v2466_v10 = vadd.f32 1e-05, %v2465_v33 }
 0x67e   : > { %2960 = vrsqrt.f32 %v2466_v10 }
 0x688   : > { %v2961_v63 = vpop.eup %2960 }
 0x689   : > { %v2468_v7 = vmul.f32 %v2961_v63, %v2460_v31 }
 0x68b   : > { %v2476_v60 = vmul.f32 %v2643_v11, %v2468_v7 }
 0x68d   : > { %v2484_v51 = vadd.f32 %v2644_v9, %v2476_v60 }
 0x68f   : > { %2485 = vst.msk [vmem:[%s501_s17] sm:$0xff] %vm1633_vm7, %v2484_v51 }
 0x690   : > { %2984 = shalt.err (!%p2981_p4)
}
 0x691   : > { %s2985_s16 = scalar_lea.hbm %s4356_s3, 128  ;;  %s2989_s17 = scalar_lea.hbm %s4414_s15, 256 }
 0x692   : > { %p2986_p7 = scmp.ne.s32.totalorder %s4356_s3, %s2985_s16  ;;  %p2990_p10 = scmp.lt.u32.totalorder %s4356_s3, %s4414_s15 }
 0x693   : > { %p2991_p11 = scmp.lt.u32.totalorder %s2989_s17, %s2985_s16  ;;  %p2993_p13 = scmp.lt.u32.totalorder %s2985_s16, %s4356_s3 }
 0x694   : > { %p2987_p8 = pnand %p2986_p7, %p3167_p5 }
 0x695   : > { %p2992_p12 = por %p2991_p11, %p2990_p10 }
 0x696   : > { %p2988_p9 = pneg %p2987_p8 }
 0x697   : > { %p2994_p0 = por %p2993_p13, %p2992_p12 }
 0x699   : > { %p2995_p1 = pnand %p2994_p0, %p2988_p9 }
 0x69b   : > { %2998 = shalt.err (!%p2995_p1)
}
 0x69c   : > { %2842 = dma.vmem_to_hbm [thread:$0]  (%p3167_p5), %s4358_s1, 128, %s4356_s3, %s2487_s27  }
 0x69d PF: > { %p2848_p2 = scmp.ge.s32.totalorder %s3033_s21, 2  ;;  %s2512_s25 = sand.u32 1, %s3021_s18  }
 0x69e   : > { %s2513_s22 = scalar_lea.sflag [#allocation3], %s2512_s25 }
 0x69f   : > { %p2845_p3 = pnand %p2848_p2, %p3171_p6 }
 0x6a1   : > { %3016 = dma.done.wait (!%p2845_p3), %s2513_s22, 128  }
 0x6a2   : > { %3018 = vsyncadd (!%p2845_p3), %s2513_s22, 4294967168  ;;  %s4521_s20 = sld [smem:[#allocation5_spill]]  ;;  %s4522_s23 = sld [smem:[#allocation6_spill]] }
 0x6a3   : > { %p25_p4 = scmp.ge.s32.totalorder %s3154_s24, 4   ;;  %s4523_s18 = smov %s3025_s19 }
 0x6a4   : > { %s4526_s21 = smov %s3154_s24 }
 0x6a5   :  { %27 = sbr.rel (!%p25_p4) target bundleno = 8 (0x8), region = 118 }
 0x6a8   : > { %s4524_s19 = smov %s4521_s20  ;;  %s4525_s20 = smov %s4522_s23 }
 0x6ac   :  { %2518 = vsyncpa [#allocation3], 1 }
 0x6ad   :  { %2520 = vsyncpa [#allocation3 + $0x1], 1 }

</bundles_post_ra>
